<compile_context>
chip_gen: v7x
topology: tpu7x:2x2x1
jax: 0.10.0
libtpu: 0.0.40
codegen_flags: <defaults>
</compile_context>

<pallas_src>
import math
import functools
import numpy as np

import jax
import jax.numpy as jnp
from jax.experimental import pallas as pl
from jax.experimental.pallas import tpu as pltpu


_VMEM = pl.BlockSpec(memory_space=pltpu.MemorySpace.VMEM)


def _call(kernel, out_shape, *args):
    """Un-gridded pallas_call with every operand resident in VMEM."""
    if isinstance(out_shape, (tuple, list)):
        out_shape = tuple(out_shape)
        out_specs = tuple(_VMEM for _ in out_shape)
    else:
        out_specs = _VMEM
    return pl.pallas_call(
        kernel,
        out_shape=out_shape,
        in_specs=[_VMEM] * len(args),
        out_specs=out_specs,
    )(*args)


# ---------------------------------------------------------------------------
# Precomputed structural matrices (block-diagonal over the batch) so per-batch
# time-axis ops (moving average, circular shift, time mean) become single MXU
# matmuls over flat [B*L, D] activations inside the fused kernels.
# ---------------------------------------------------------------------------

def _block_diag(blk, B):
    L = blk.shape[0]
    out = np.zeros((B * L, B * L), dtype=np.float32)
    for b in range(B):
        out[b * L:(b + 1) * L, b * L:(b + 1) * L] = blk
    return out


@functools.lru_cache(maxsize=None)
def _avg_full_np(L, B, k):
    # moving_avg with replicate padding, expressed as an [L, L] averaging matrix
    pad = (k - 1) // 2
    A = np.zeros((L, L), dtype=np.float32)
    for i in range(L):
        for s in range(k):
            j = min(max(i + s - pad, 0), L - 1)
            A[i, j] += 1.0 / k
    return _block_diag(A, B)


@functools.lru_cache(maxsize=None)
def _shift_full_np(L, B):
    # (Rp @ x)[l] = x[(l-1) % L], (Rm @ x)[l] = x[(l+1) % L], per batch block
    Rp = np.zeros((L, L), dtype=np.float32)
    Rm = np.zeros((L, L), dtype=np.float32)
    for l in range(L):
        Rp[l, (l - 1) % L] = 1.0
        Rm[l, (l + 1) % L] = 1.0
    return _block_diag(Rp, B), _block_diag(Rm, B)


@functools.lru_cache(maxsize=None)
def _time_mean_full_np(L, B):
    return _block_diag(np.full((L, L), 1.0 / L, dtype=np.float32), B)


def _avg_full(L, B, k):
    return jnp.asarray(_avg_full_np(L, B, k))


def _shift_full(L, B):
    Rp, Rm = _shift_full_np(L, B)
    return jnp.asarray(Rp), jnp.asarray(Rm)


def _time_mean_full(L, B):
    return jnp.asarray(_time_mean_full_np(L, B))


# ---------------------------------------------------------------------------
# Pallas kernels (all operate on flat [B*L, D] slabs fully resident in VMEM)
# ---------------------------------------------------------------------------

def _dot(a, b):
    return jnp.dot(a, b, preferred_element_type=jnp.float32)


def _gelu(x):
    # exact-erf GELU (PyTorch F.gelu default)
    return 0.5 * x * (1.0 + jax.lax.erf(x * 0.7071067811865476))


def _linear_kernel(x_ref, w_ref, b_ref, o_ref):
    # fused projection: o = x @ w + b   (used for QKV with w = [wq|wk|wv])
    o_ref[...] = _dot(x_ref[...], w_ref[...]) + b_ref[...]


def _embed_kernel(rp_ref, rm_ref, xs_ref, w0_ref, w1_ref, w2_ref, o_ref):
    # TokenEmbedding: Conv1d(1, d_model, k=3, circular padding, no bias).
    # xs: [B*L, 1]; wk: [1, d_model]; circular shifts via block-diag shift matmuls.
    xs = xs_ref[...]
    xp = _dot(rp_ref[...], xs)       # x[(l-1) % L]
    xm = _dot(rm_ref[...], xs)       # x[(l+1) % L]
    o_ref[...] = xp * w0_ref[...] + xs * w1_ref[...] + xm * w2_ref[...]


def _decomp_kernel(a_ref, x_ref, s_ref, t_ref):
    # series_decomp: trend = moving_avg(x) (as matmul), seasonal = x - trend
    x = x_ref[...]
    t = _dot(a_ref[...], x)
    t_ref[...] = t
    s_ref[...] = x - t


def _enc_post_kernel(a_ref, attn_ref, x_ref, wo_ref, bo_ref, w1_ref, w2_ref, o_ref):
    # EncoderLayer tail, fused: out-projection + residual + decomp1 (seasonal only)
    # + FFN (conv1/GELU/conv2, bias-free) + residual + decomp2 (seasonal only)
    a = a_ref[...]
    u = x_ref[...] + _dot(attn_ref[...], wo_ref[...]) + bo_ref[...]
    s1 = u - _dot(a, u)
    y = _dot(_gelu(_dot(s1, w1_ref[...])), w2_ref[...])
    u2 = s1 + y
    o_ref[...] = u2 - _dot(a, u2)


def _norm_kernel(m_ref, x_ref, g_ref, b_ref, o_ref):
    # my_Layernorm: LayerNorm over channels, then subtract per-batch time mean
    x = x_ref[...]
    mu = jnp.mean(x, axis=-1, keepdims=True)
    var = jnp.mean(jnp.square(x - mu), axis=-1, keepdims=True)
    xh = (x - mu) * jax.lax.rsqrt(var + 1e-5) * g_ref[...] + b_ref[...]
    o_ref[...] = xh - _dot(m_ref[...], xh)


def _dec_a_kernel(a_ref, attn_ref, x_ref, cross_ref, wo_ref, bo_ref,
                  wq_ref, bq_ref, wkv_ref, bkv_ref,
                  x1_ref, t1_ref, q_ref, kv_ref):
    # DecoderLayer first half, fused: self-attn out-proj + residual + decomp1
    # + cross-attention Q projection (of x1) + fused cross K/V projection (of enc_out)
    u = x_ref[...] + _dot(attn_ref[...], wo_ref[...]) + bo_ref[...]
    t1 = _dot(a_ref[...], u)
    x1 = u - t1
    x1_ref[...] = x1
    t1_ref[...] = t1
    q_ref[...] = _dot(x1, wq_ref[...]) + bq_ref[...]
    kv_ref[...] = _dot(cross_ref[...], wkv_ref[...]) + bkv_ref[...]


def _dec_b_kernel(a_ref, rp_ref, rm_ref, attn_ref, x1_ref, t1_ref, trend_ref,
                  wo_ref, bo_ref, w1_ref, w2_ref, wproj_ref, xo_ref, to_ref):
    # DecoderLayer second half, fused: cross-attn out-proj + residual + decomp2
    # + FFN/GELU + residual + decomp3 + trend sum + k=3 circular trend projection
    # (Conv1d(d_model, 1), no bias) + accumulation into the running trend.
    a = a_ref[...]
    u = x1_ref[...] + _dot(attn_ref[...], wo_ref[...]) + bo_ref[...]
    t2 = _dot(a, u)
    x2 = u - t2
    y = _dot(_gelu(_dot(x2, w1_ref[...])), w2_ref[...])
    u3 = x2 + y
    t3 = _dot(a, u3)
    xo_ref[...] = u3 - t3
    rt = t1_ref[...] + t2 + t3                                   # [B*L, D]
    D = rt.shape[1]
    wp = wproj_ref[...]                                          # [3D, 1]
    proj = (_dot(_dot(rp_ref[...], rt), wp[0:D, :])
            + _dot(rt, wp[D:2 * D, :])
            + _dot(_dot(rm_ref[...], rt), wp[2 * D:3 * D, :]))
    to_ref[...] = trend_ref[...] + proj


def _dec_final_kernel(m_ref, x_ref, g_ref, b_ref, w_ref, bw_ref, trend_ref, o_ref):
    # Decoder tail, fused: my_Layernorm + Linear(d_model -> 1, bias) + add trend
    x = x_ref[...]
    mu = jnp.mean(x, axis=-1, keepdims=True)
    var = jnp.mean(jnp.square(x - mu), axis=-1, keepdims=True)
    xh = (x - mu) * jax.lax.rsqrt(var + 1e-5) * g_ref[...] + b_ref[...]
    xh = xh - _dot(m_ref[...], xh)
    o_ref[...] = trend_ref[...] + _dot(xh, w_ref[...]) + bw_ref[...]


# ---------------------------------------------------------------------------
# Wrappers
# ---------------------------------------------------------------------------

def token_embedding(xs2d, w_r, B, L):
    # xs2d: [B*L, 1]; w_r: [3, d_model] with w_r[k, d] = conv_w[d, 0, k]
    Rp, Rm = _shift_full(L, B)
    D = w_r.shape[1]
    return _call(_embed_kernel, jax.ShapeDtypeStruct((B * L, D), jnp.float32),
                 Rp, Rm, xs2d, w_r[0:1, :], w_r[1:2, :], w_r[2:3, :])


def auto_correlation(q, k, v, factor):
    # q: [B, L, H, E]; k, v: [B, S, H, E] -> [B, L, H, E]
    B, L, H, E = q.shape
    S = k.shape[1]
    if L > S:
        pad = jnp.zeros((B, L - S, H, E), q.dtype)
        v = jnp.concatenate([v, pad], axis=1)
        k = jnp.concatenate([k, pad], axis=1)
    else:
        v = v[:, :L]
        k = k[:, :L]

    qp = jnp.transpose(q, (0, 2, 3, 1))                          # [B, H, E, L]
    kp = jnp.transpose(k, (0, 2, 3, 1))
    vp = jnp.transpose(v, (0, 2, 3, 1))

    # TODO(synk): FFT-based period correlation has no Pallas/Mosaic equivalent;
    # kept as plain JAX (XLA) ops.
    corr = jnp.fft.irfft(jnp.fft.rfft(qp, axis=-1) * jnp.conj(jnp.fft.rfft(kp, axis=-1)),
                         n=L, axis=-1)                           # [B, H, E, L]

    # time_delay_agg_training (module is in training mode; dropout=0)
    top_k = int(factor * math.log(L))
    mean_value = jnp.mean(jnp.mean(corr, axis=1), axis=1)        # [B, L]
    _, index = jax.lax.top_k(jnp.mean(mean_value, axis=0), top_k)  # [top_k]
    weights = jnp.take(mean_value, index, axis=1)                # [B, top_k]
    tmp_corr = jax.nn.softmax(weights, axis=-1)

    # single vectorized gather over all top_k delays (replaces a python loop of rolls)
    idx = (jnp.arange(L)[None, :] + index[:, None]) % L          # [top_k, L]
    patterns = jnp.take(vp, idx, axis=-1)                        # [B, H, E, top_k, L]
    delays_agg = jnp.einsum('bheil,bi->bhel', patterns, tmp_corr)
    return jnp.transpose(delays_agg, (0, 3, 1, 2))               # [B, L, H, E]


def encoder_layer(p, x2d, B, L, n_heads, factor, moving_avg):
    D = x2d.shape[1]
    E = D // n_heads
    qkv = _call(_linear_kernel, jax.ShapeDtypeStruct((B * L, 3 * D), jnp.float32),
                x2d, p['wqkv'], p['bqkv'])                       # fused Q/K/V
    q = qkv[:, :D].reshape(B, L, n_heads, E)
    k = qkv[:, D:2 * D].reshape(B, L, n_heads, E)
    v = qkv[:, 2 * D:].reshape(B, L, n_heads, E)
    attn = auto_correlation(q, k, v, factor).reshape(B * L, D)

    A = _avg_full(L, B, moving_avg)
    return _call(_enc_post_kernel, jax.ShapeDtypeStruct((B * L, D), jnp.float32),
                 A, attn, x2d, p['wo'], p['bo'], p['w1'], p['w2'])


def decoder_layer(p, x2d, cross2d, trend2d, B, L, S, n_heads, factor, moving_avg):
    D = x2d.shape[1]
    E = D // n_heads
    # fused self-attention Q/K/V projection
    qkv = _call(_linear_kernel, jax.ShapeDtypeStruct((B * L, 3 * D), jnp.float32),
                x2d, p['self_wqkv'], p['self_bqkv'])
    q = qkv[:, :D].reshape(B, L, n_heads, E)
    k = qkv[:, D:2 * D].reshape(B, L, n_heads, E)
    v = qkv[:, 2 * D:].reshape(B, L, n_heads, E)
    sattn = auto_correlation(q, k, v, factor).reshape(B * L, D)

    A = _avg_full(L, B, moving_avg)
    x1, t1, qc, kv = _call(
        _dec_a_kernel,
        (jax.ShapeDtypeStruct((B * L, D), jnp.float32),
         jax.ShapeDtypeStruct((B * L, D), jnp.float32),
         jax.ShapeDtypeStruct((B * L, D), jnp.float32),
         jax.ShapeDtypeStruct((B * S, 2 * D), jnp.float32)),
        A, sattn, x2d, cross2d,
        p['self_wo'], p['self_bo'],
        p['cross_wq'], p['cross_bq'], p['cross_wkv'], p['cross_bkv'])
    q2 = qc.reshape(B, L, n_heads, E)
    k2 = kv[:, :D].reshape(B, S, n_heads, E)
    v2 = kv[:, D:].reshape(B, S, n_heads, E)
    cattn = auto_correlation(q2, k2, v2, factor).reshape(B * L, D)

    Rp, Rm = _shift_full(L, B)
    x3, trend_new = _call(
        _dec_b_kernel,
        (jax.ShapeDtypeStruct((B * L, D), jnp.float32),
         jax.ShapeDtypeStruct((B * L, 1), jnp.float32)),
        A, Rp, Rm, cattn, x1, t1, trend2d,
        p['cross_wo'], p['cross_bo'], p['w1'], p['w2'], p['wproj'])
    return x3, trend_new


# ---------------------------------------------------------------------------
# Full Autoformer forward
# ---------------------------------------------------------------------------

def autoformer_forward(params, x_enc, x_dec, *, label_len, pred_len,
                       n_heads=4, factor=5, enc_moving_avg=5):
    # x_enc: [L_enc, B, 1], x_dec: [L_dec_in, B, 1] (PyTorch-style time-major inputs)
    x_enc = jnp.nan_to_num(x_enc.astype(jnp.float32))
    x_dec = jnp.nan_to_num(x_dec.astype(jnp.float32))

    # --- encoder ---
    x_enc_t = jnp.transpose(x_enc, (1, 0, 2))                    # [B, L_enc, 1]
    B, L_enc, _ = x_enc_t.shape
    enc2d = token_embedding(x_enc_t.reshape(B * L_enc, 1), params['enc_embed_w'], B, L_enc)
    for lp in params['enc_layers']:
        # EncoderLayer(..., moving_avg=5) per the reference module
        enc2d = encoder_layer(lp, enc2d, B, L_enc, n_heads, factor, enc_moving_avg)
    M_enc = _time_mean_full(L_enc, B)
    enc2d = _call(_norm_kernel, jax.ShapeDtypeStruct((B * L_enc, enc2d.shape[1]), jnp.float32),
                  M_enc, enc2d, params['enc_norm_g'], params['enc_norm_b'])

    # --- decoder init ---
    x_dec_t = jnp.transpose(x_dec, (1, 0, 2))                    # [B, L_dec_in, 1]
    L_dec = label_len + pred_len
    mean = jnp.repeat(jnp.mean(x_enc_t, axis=1, keepdims=True), pred_len, axis=1)
    zeros = jnp.zeros((B, pred_len, x_dec_t.shape[2]), jnp.float32)
    # top-level series_decomp(kernel_size=factor) per the reference module
    A_top = _avg_full(L_enc, B, factor)
    seas2d, trend2d0 = _call(
        _decomp_kernel,
        (jax.ShapeDtypeStruct((B * L_enc, 1), jnp.float32),
         jax.ShapeDtypeStruct((B * L_enc, 1), jnp.float32)),
        A_top, x_enc_t.reshape(B * L_enc, 1))
    seasonal_init = seas2d.reshape(B, L_enc, 1)
    trend_init = trend2d0.reshape(B, L_enc, 1)
    trend_init = jnp.concatenate([trend_init[:, -label_len:, :], mean], axis=1)
    seasonal_init = jnp.concatenate([seasonal_init[:, -label_len:, :], zeros], axis=1)

    # --- decoder ---
    dec2d = token_embedding(seasonal_init.reshape(B * L_dec, 1), params['dec_embed_w'], B, L_dec)
    trend2d = trend_init.reshape(B * L_dec, 1)
    for lp in params['dec_layers']:
        # DecoderLayer(..., moving_avg=factor) per the reference module
        dec2d, trend2d = decoder_layer(lp, dec2d, enc2d, trend2d, B, L_dec, L_enc,
                                       n_heads, factor, factor)
    M_dec = _time_mean_full(L_dec, B)
    out2d = _call(_dec_final_kernel, jax.ShapeDtypeStruct((B * L_dec, 1), jnp.float32),
                  M_dec, dec2d, params['dec_norm_g'], params['dec_norm_b'],
                  params['out_proj_w'], params['out_proj_b'], trend2d)
    dec_out = out2d.reshape(B, L_dec, 1)
    return jnp.transpose(dec_out, (1, 0, 2))                     # [L_dec, B, 1]


# ---------------------------------------------------------------------------
# Deterministic parameter init (fused-weight layout)
# ---------------------------------------------------------------------------

def init_params(key, d_model=32, n_heads=4, e_layers=2, d_layers=2):
    d_ff = 4 * d_model
    keys = iter(jax.random.split(key, 256))

    def nrm(shape, scale=0.1):
        return (scale * jax.random.normal(next(keys), shape)).astype(jnp.float32)

    def enc_layer_params():
        return dict(
            wqkv=nrm((d_model, 3 * d_model)),            # [wq | wk | wv]
            bqkv=jnp.zeros((1, 3 * d_model), jnp.float32),
            wo=nrm((d_model, d_model)), bo=jnp.zeros((1, d_model), jnp.float32),
            w1=nrm((d_model, d_ff)), w2=nrm((d_ff, d_model)),      # FFN convs, no bias
        )

    def dec_layer_params():
        return dict(
            self_wqkv=nrm((d_model, 3 * d_model)),
            self_bqkv=jnp.zeros((1, 3 * d_model), jnp.float32),
            self_wo=nrm((d_model, d_model)), self_bo=jnp.zeros((1, d_model), jnp.float32),
            cross_wq=nrm((d_model, d_model)), cross_bq=jnp.zeros((1, d_model), jnp.float32),
            cross_wkv=nrm((d_model, 2 * d_model)),        # [wk | wv]
            cross_bkv=jnp.zeros((1, 2 * d_model), jnp.float32),
            cross_wo=nrm((d_model, d_model)), cross_bo=jnp.zeros((1, d_model), jnp.float32),
            w1=nrm((d_model, d_ff)), w2=nrm((d_ff, d_model)),
            wproj=nrm((3 * d_model, 1)),                  # Conv1d(d_model, 1, k=3), no bias
        )

    params = dict(
        enc_embed_w=nrm((3, d_model)),                    # [k, d_model] of Conv1d(1, d_model, 3)
        dec_embed_w=nrm((3, d_model)),
        enc_layers=[enc_layer_params() for _ in range(e_layers)],
        enc_norm_g=jnp.ones((1, d_model), jnp.float32),
        enc_norm_b=jnp.zeros((1, d_model), jnp.float32),
        dec_layers=[dec_layer_params() for _ in range(d_layers)],
        dec_norm_g=jnp.ones((1, d_model), jnp.float32),
        dec_norm_b=jnp.zeros((1, d_model), jnp.float32),
        out_proj_w=nrm((d_model, 1)),
        out_proj_b=jnp.zeros((1, 1), jnp.float32),
    )
    return params


# ---------------------------------------------------------------------------
# Main
# ---------------------------------------------------------------------------

if __name__ == "__main__":
    # small shapes consistent with the module
    seq_len, label_len, pred_len = 16, 8, 8
    batch = 2
    d_model, n_heads, e_layers, d_layers, factor = 32, 4, 2, 2, 5

    key = jax.random.PRNGKey(0)
    k1, k2, kp = jax.random.split(key, 3)
    x_enc = jax.random.normal(k1, (seq_len, batch, 1), dtype=jnp.float32)
    x_dec = jax.random.normal(k2, (label_len + pred_len, batch, 1), dtype=jnp.float32)

    params = init_params(kp, d_model=d_model, n_heads=n_heads,
                         e_layers=e_layers, d_layers=d_layers)

    fwd = jax.jit(lambda p, xe, xd: autoformer_forward(
        p, xe, xd, label_len=label_len, pred_len=pred_len,
        n_heads=n_heads, factor=factor, enc_moving_avg=5))

    out = fwd(params, x_enc, x_dec)
    out = jax.block_until_ready(out)
    assert out.shape == (label_len + pred_len, batch, 1)
    assert bool(jnp.all(jnp.isfinite(out)))
    print("KERNEL_OK")
</pallas_src>

<mosaic_0001>
module attributes {stable_mosaic.version = 11 : i64} {
  func.func @_decomp_kernel(%arg0: memref<32x32xf32, #tpu.memory_space<vmem>>, %arg1: memref<32x1xf32, #tpu.memory_space<vmem>>, %arg2: memref<32x1xf32, #tpu.memory_space<vmem>>, %arg3: memref<32x1xf32, #tpu.memory_space<vmem>>) attributes {dimension_semantics = [], scalar_prefetch = 0 : i64, scratch_operands = 0 : i64, tpu.core_type = #tpu.core_type<tc>} {
    %c0 = arith.constant 0 : index
    %c0_0 = arith.constant 0 : index
    %0 = vector.load %arg1[%c0, %c0_0] : memref<32x1xf32, #tpu.memory_space<vmem>>, vector<32x1xf32>
    %c0_1 = arith.constant 0 : index
    %c0_2 = arith.constant 0 : index
    %1 = vector.load %arg0[%c0_1, %c0_2] : memref<32x32xf32, #tpu.memory_space<vmem>>, vector<32x32xf32>
    %cst = arith.constant dense<0.000000e+00> : vector<32x1xf32>
    %2 = tpu.matmul %1, %0, %cst {dimension_numbers = #tpu.dot_dimension_numbers<[1], [0], [0], [1], [0, 0, 1, 1], [], []>} : vector<32x32xf32>, vector<32x1xf32>, vector<32x1xf32> -> vector<32x1xf32>
    %c0_3 = arith.constant 0 : index
    %c0_4 = arith.constant 0 : index
    %3 = vector.load %arg3[%c0_3, %c0_4] : memref<32x1xf32, #tpu.memory_space<vmem>>, vector<32x1xf32>
    tpu.vector_store %arg3[%c0_3, %c0_4], %2 {strides = array<i32>} : memref<32x1xf32, #tpu.memory_space<vmem>>, vector<32x1xf32>,
    %4 = arith.subf %0, %2 : vector<32x1xf32>
    %c0_5 = arith.constant 0 : index
    %c0_6 = arith.constant 0 : index
    %5 = vector.load %arg2[%c0_5, %c0_6] : memref<32x1xf32, #tpu.memory_space<vmem>>, vector<32x1xf32>
    tpu.vector_store %arg2[%c0_5, %c0_6], %4 {strides = array<i32>} : memref<32x1xf32, #tpu.memory_space<vmem>>, vector<32x1xf32>,
    return
  }
}

module attributes {stable_mosaic.version = 11 : i64} {
  func.func @_embed_kernel(%arg0: memref<32x32xf32, #tpu.memory_space<vmem>>, %arg1: memref<32x32xf32, #tpu.memory_space<vmem>>, %arg2: memref<32x1xf32, #tpu.memory_space<vmem>>, %arg3: memref<1x32xf32, #tpu.memory_space<vmem>>, %arg4: memref<1x32xf32, #tpu.memory_space<vmem>>, %arg5: memref<1x32xf32, #tpu.memory_space<vmem>>, %arg6: memref<32x32xf32, #tpu.memory_space<vmem>>) attributes {dimension_semantics = [], scalar_prefetch = 0 : i64, scratch_operands = 0 : i64, tpu.core_type = #tpu.core_type<tc>} {
    %c0 = arith.constant 0 : index
    %c0_0 = arith.constant 0 : index
    %0 = vector.load %arg2[%c0, %c0_0] : memref<32x1xf32, #tpu.memory_space<vmem>>, vector<32x1xf32>
    %c0_1 = arith.constant 0 : index
    %c0_2 = arith.constant 0 : index
    %1 = vector.load %arg0[%c0_1, %c0_2] : memref<32x32xf32, #tpu.memory_space<vmem>>, vector<32x32xf32>
    %cst = arith.constant dense<0.000000e+00> : vector<32x1xf32>
    %2 = tpu.matmul %1, %0, %cst {dimension_numbers = #tpu.dot_dimension_numbers<[1], [0], [0], [1], [0, 0, 1, 1], [], []>} : vector<32x32xf32>, vector<32x1xf32>, vector<32x1xf32> -> vector<32x1xf32>
    %c0_3 = arith.constant 0 : index
    %c0_4 = arith.constant 0 : index
    %3 = vector.load %arg1[%c0_3, %c0_4] : memref<32x32xf32, #tpu.memory_space<vmem>>, vector<32x32xf32>
    %cst_5 = arith.constant dense<0.000000e+00> : vector<32x1xf32>
    %4 = tpu.matmul %3, %0, %cst_5 {dimension_numbers = #tpu.dot_dimension_numbers<[1], [0], [0], [1], [0, 0, 1, 1], [], []>} : vector<32x32xf32>, vector<32x1xf32>, vector<32x1xf32> -> vector<32x1xf32>
    %c0_6 = arith.constant 0 : index
    %c0_7 = arith.constant 0 : index
    %5 = vector.load %arg3[%c0_6, %c0_7] : memref<1x32xf32, #tpu.memory_space<vmem>>, vector<1x32xf32>
    %6 = vector.broadcast %2 : vector<32x1xf32> to vector<32x32xf32>
    %7 = vector.broadcast %5 : vector<1x32xf32> to vector<32x32xf32>
    %8 = arith.mulf %6, %7 : vector<32x32xf32>
    %c0_8 = arith.constant 0 : index
    %c0_9 = arith.constant 0 : index
    %9 = vector.load %arg4[%c0_8, %c0_9] : memref<1x32xf32, #tpu.memory_space<vmem>>, vector<1x32xf32>
    %10 = vector.broadcast %0 : vector<32x1xf32> to vector<32x32xf32>
    %11 = vector.broadcast %9 : vector<1x32xf32> to vector<32x32xf32>
    %12 = arith.mulf %10, %11 : vector<32x32xf32>
    %13 = arith.addf %8, %12 : vector<32x32xf32>
    %c0_10 = arith.constant 0 : index
    %c0_11 = arith.constant 0 : index
    %14 = vector.load %arg5[%c0_10, %c0_11] : memref<1x32xf32, #tpu.memory_space<vmem>>, vector<1x32xf32>
    %15 = vector.broadcast %4 : vector<32x1xf32> to vector<32x32xf32>
    %16 = vector.broadcast %14 : vector<1x32xf32> to vector<32x32xf32>
    %17 = arith.mulf %15, %16 : vector<32x32xf32>
    %18 = arith.addf %13, %17 : vector<32x32xf32>
    %c0_12 = arith.constant 0 : index
    %c0_13 = arith.constant 0 : index
    %19 = vector.load %arg6[%c0_12, %c0_13] : memref<32x32xf32, #tpu.memory_space<vmem>>, vector<32x32xf32>
    tpu.vector_store %arg6[%c0_12, %c0_13], %18 {strides = array<i32>} : memref<32x32xf32, #tpu.memory_space<vmem>>, vector<32x32xf32>,
    return
  }
}

module attributes {stable_mosaic.version = 11 : i64} {
  func.func @_linear_kernel(%arg0: memref<32x32xf32, #tpu.memory_space<vmem>>, %arg1: memref<32x96xf32, #tpu.memory_space<vmem>>, %arg2: memref<1x96xf32, #tpu.memory_space<vmem>>, %arg3: memref<32x96xf32, #tpu.memory_space<vmem>>) attributes {dimension_semantics = [], scalar_prefetch = 0 : i64, scratch_operands = 0 : i64, tpu.core_type = #tpu.core_type<tc>} {
    %c0 = arith.constant 0 : index
    %c0_0 = arith.constant 0 : index
    %0 = vector.load %arg0[%c0, %c0_0] : memref<32x32xf32, #tpu.memory_space<vmem>>, vector<32x32xf32>
    %c0_1 = arith.constant 0 : index
    %c0_2 = arith.constant 0 : index
    %1 = vector.load %arg1[%c0_1, %c0_2] : memref<32x96xf32, #tpu.memory_space<vmem>>, vector<32x96xf32>
    %cst = arith.constant dense<0.000000e+00> : vector<32x96xf32>
    %2 = tpu.matmul %0, %1, %cst {dimension_numbers = #tpu.dot_dimension_numbers<[1], [0], [0], [1], [0, 0, 1, 1], [], []>} : vector<32x32xf32>, vector<32x96xf32>, vector<32x96xf32> -> vector<32x96xf32>
    %c0_3 = arith.constant 0 : index
    %c0_4 = arith.constant 0 : index
    %3 = vector.load %arg2[%c0_3, %c0_4] : memref<1x96xf32, #tpu.memory_space<vmem>>, vector<1x96xf32>
    %4 = vector.broadcast %3 : vector<1x96xf32> to vector<32x96xf32>
    %5 = arith.addf %2, %4 : vector<32x96xf32>
    %c0_5 = arith.constant 0 : index
    %c0_6 = arith.constant 0 : index
    %6 = vector.load %arg3[%c0_5, %c0_6] : memref<32x96xf32, #tpu.memory_space<vmem>>, vector<32x96xf32>
    tpu.vector_store %arg3[%c0_5, %c0_6], %5 {strides = array<i32>} : memref<32x96xf32, #tpu.memory_space<vmem>>, vector<32x96xf32>,
    return
  }
}

module attributes {stable_mosaic.version = 11 : i64} {
  func.func @_enc_post_kernel(%arg0: memref<32x32xf32, #tpu.memory_space<vmem>>, %arg1: memref<32x32xf32, #tpu.memory_space<vmem>>, %arg2: memref<32x32xf32, #tpu.memory_space<vmem>>, %arg3: memref<32x32xf32, #tpu.memory_space<vmem>>, %arg4: memref<1x32xf32, #tpu.memory_space<vmem>>, %arg5: memref<32x128xf32, #tpu.memory_space<vmem>>, %arg6: memref<128x32xf32, #tpu.memory_space<vmem>>, %arg7: memref<32x32xf32, #tpu.memory_space<vmem>>) attributes {dimension_semantics = [], scalar_prefetch = 0 : i64, scratch_operands = 0 : i64, tpu.core_type = #tpu.core_type<tc>} {
    %c0 = arith.constant 0 : index
    %c0_0 = arith.constant 0 : index
    %0 = vector.load %arg0[%c0, %c0_0] : memref<32x32xf32, #tpu.memory_space<vmem>>, vector<32x32xf32>
    %c0_1 = arith.constant 0 : index
    %c0_2 = arith.constant 0 : index
    %1 = vector.load %arg2[%c0_1, %c0_2] : memref<32x32xf32, #tpu.memory_space<vmem>>, vector<32x32xf32>
    %c0_3 = arith.constant 0 : index
    %c0_4 = arith.constant 0 : index
    %2 = vector.load %arg1[%c0_3, %c0_4] : memref<32x32xf32, #tpu.memory_space<vmem>>, vector<32x32xf32>
    %c0_5 = arith.constant 0 : index
    %c0_6 = arith.constant 0 : index
    %3 = vector.load %arg3[%c0_5, %c0_6] : memref<32x32xf32, #tpu.memory_space<vmem>>, vector<32x32xf32>
    %cst = arith.constant dense<0.000000e+00> : vector<32x32xf32>
    %4 = tpu.matmul %2, %3, %cst {dimension_numbers = #tpu.dot_dimension_numbers<[1], [0], [0], [1], [0, 0, 1, 1], [], []>} : vector<32x32xf32>, vector<32x32xf32>, vector<32x32xf32> -> vector<32x32xf32>
    %5 = arith.addf %1, %4 : vector<32x32xf32>
    %c0_7 = arith.constant 0 : index
    %c0_8 = arith.constant 0 : index
    %6 = vector.load %arg4[%c0_7, %c0_8] : memref<1x32xf32, #tpu.memory_space<vmem>>, vector<1x32xf32>
    %7 = vector.broadcast %6 : vector<1x32xf32> to vector<32x32xf32>
    %8 = arith.addf %5, %7 : vector<32x32xf32>
    %cst_9 = arith.constant dense<0.000000e+00> : vector<32x32xf32>
    %9 = tpu.matmul %0, %8, %cst_9 {dimension_numbers = #tpu.dot_dimension_numbers<[1], [0], [0], [1], [0, 0, 1, 1], [], []>} : vector<32x32xf32>, vector<32x32xf32>, vector<32x32xf32> -> vector<32x32xf32>
    %10 = arith.subf %8, %9 : vector<32x32xf32>
    %c0_10 = arith.constant 0 : index
    %c0_11 = arith.constant 0 : index
    %11 = vector.load %arg5[%c0_10, %c0_11] : memref<32x128xf32, #tpu.memory_space<vmem>>, vector<32x128xf32>
    %cst_12 = arith.constant dense<0.000000e+00> : vector<32x128xf32>
    %12 = tpu.matmul %10, %11, %cst_12 {dimension_numbers = #tpu.dot_dimension_numbers<[1], [0], [0], [1], [0, 0, 1, 1], [], []>} : vector<32x32xf32>, vector<32x128xf32>, vector<32x128xf32> -> vector<32x128xf32>
    %cst_13 = arith.constant 5.000000e-01 : f32
    %13 = vector.broadcast %cst_13 : f32 to vector<32x128xf32>
    %14 = arith.mulf %13, %12 : vector<32x128xf32>
    %cst_14 = arith.constant 0.707106769 : f32
    %15 = vector.broadcast %cst_14 : f32 to vector<32x128xf32>
    %16 = arith.mulf %12, %15 : vector<32x128xf32>
    %17 = math.erf %16 : vector<32x128xf32>
    %cst_15 = arith.constant 1.000000e+00 : f32
    %18 = vector.broadcast %cst_15 : f32 to vector<32x128xf32>
    %19 = arith.addf %18, %17 : vector<32x128xf32>
    %20 = arith.mulf %14, %19 : vector<32x128xf32>
    %c0_16 = arith.constant 0 : index
    %c0_17 = arith.constant 0 : index
    %21 = vector.load %arg6[%c0_16, %c0_17] : memref<128x32xf32, #tpu.memory_space<vmem>>, vector<128x32xf32>
    %cst_18 = arith.constant dense<0.000000e+00> : vector<32x32xf32>
    %22 = tpu.matmul %20, %21, %cst_18 {dimension_numbers = #tpu.dot_dimension_numbers<[1], [0], [0], [1], [0, 0, 1, 1], [], []>} : vector<32x128xf32>, vector<128x32xf32>, vector<32x32xf32> -> vector<32x32xf32>
    %23 = arith.addf %10, %22 : vector<32x32xf32>
    %cst_19 = arith.constant dense<0.000000e+00> : vector<32x32xf32>
    %24 = tpu.matmul %0, %23, %cst_19 {dimension_numbers = #tpu.dot_dimension_numbers<[1], [0], [0], [1], [0, 0, 1, 1], [], []>} : vector<32x32xf32>, vector<32x32xf32>, vector<32x32xf32> -> vector<32x32xf32>
    %25 = arith.subf %23, %24 : vector<32x32xf32>
    %c0_20 = arith.constant 0 : index
    %c0_21 = arith.constant 0 : index
    %26 = vector.load %arg7[%c0_20, %c0_21] : memref<32x32xf32, #tpu.memory_space<vmem>>, vector<32x32xf32>
    tpu.vector_store %arg7[%c0_20, %c0_21], %25 {strides = array<i32>} : memref<32x32xf32, #tpu.memory_space<vmem>>, vector<32x32xf32>,
    return
  }
}

module attributes {stable_mosaic.version = 11 : i64} {
  func.func @_norm_kernel(%arg0: memref<32x32xf32, #tpu.memory_space<vmem>>, %arg1: memref<32x32xf32, #tpu.memory_space<vmem>>, %arg2: memref<1x32xf32, #tpu.memory_space<vmem>>, %arg3: memref<1x32xf32, #tpu.memory_space<vmem>>, %arg4: memref<32x32xf32, #tpu.memory_space<vmem>>) attributes {dimension_semantics = [], scalar_prefetch = 0 : i64, scratch_operands = 0 : i64, tpu.core_type = #tpu.core_type<tc>} {
    %c0 = arith.constant 0 : index
    %c0_0 = arith.constant 0 : index
    %0 = vector.load %arg1[%c0, %c0_0] : memref<32x32xf32, #tpu.memory_space<vmem>>, vector<32x32xf32>
    %cst = arith.constant dense<0.000000e+00> : vector<32xf32>
    %1 = vector.multi_reduction <add>, %0, %cst [1] : vector<32x32xf32> to vector<32xf32>
    %2 = vector.shape_cast %1 : vector<32xf32> to vector<32x1xf32>
    %cst_1 = arith.constant 3.200000e+01 : f32
    %3 = vector.broadcast %cst_1 : f32 to vector<32x1xf32>
    %4 = arith.divf %2, %3 : vector<32x1xf32>
    %5 = vector.broadcast %4 : vector<32x1xf32> to vector<32x32xf32>
    %6 = arith.subf %0, %5 : vector<32x32xf32>
    %7 = arith.mulf %6, %6 : vector<32x32xf32>
    %cst_2 = arith.constant dense<0.000000e+00> : vector<32xf32>
    %8 = vector.multi_reduction <add>, %7, %cst_2 [1] : vector<32x32xf32> to vector<32xf32>
    %9 = vector.shape_cast %8 : vector<32xf32> to vector<32x1xf32>
    %cst_3 = arith.constant 3.200000e+01 : f32
    %10 = vector.broadcast %cst_3 : f32 to vector<32x1xf32>
    %11 = arith.divf %9, %10 : vector<32x1xf32>
    %12 = vector.broadcast %4 : vector<32x1xf32> to vector<32x32xf32>
    %13 = arith.subf %0, %12 : vector<32x32xf32>
    %cst_4 = arith.constant 9.99999974E-6 : f32
    %14 = vector.broadcast %cst_4 : f32 to vector<32x1xf32>
    %15 = arith.addf %11, %14 : vector<32x1xf32>
    %16 = math.rsqrt %15 : vector<32x1xf32>
    %17 = vector.broadcast %16 : vector<32x1xf32> to vector<32x32xf32>
    %18 = arith.mulf %13, %17 : vector<32x32xf32>
    %c0_5 = arith.constant 0 : index
    %c0_6 = arith.constant 0 : index
    %19 = vector.load %arg2[%c0_5, %c0_6] : memref<1x32xf32, #tpu.memory_space<vmem>>, vector<1x32xf32>
    %20 = vector.broadcast %19 : vector<1x32xf32> to vector<32x32xf32>
    %21 = arith.mulf %18, %20 : vector<32x32xf32>
    %c0_7 = arith.constant 0 : index
    %c0_8 = arith.constant 0 : index
    %22 = vector.load %arg3[%c0_7, %c0_8] : memref<1x32xf32, #tpu.memory_space<vmem>>, vector<1x32xf32>
    %23 = vector.broadcast %22 : vector<1x32xf32> to vector<32x32xf32>
    %24 = arith.addf %21, %23 : vector<32x32xf32>
    %c0_9 = arith.constant 0 : index
    %c0_10 = arith.constant 0 : index
    %25 = vector.load %arg0[%c0_9, %c0_10] : memref<32x32xf32, #tpu.memory_space<vmem>>, vector<32x32xf32>
    %cst_11 = arith.constant dense<0.000000e+00> : vector<32x32xf32>
    %26 = tpu.matmul %25, %24, %cst_11 {dimension_numbers = #tpu.dot_dimension_numbers<[1], [0], [0], [1], [0, 0, 1, 1], [], []>} : vector<32x32xf32>, vector<32x32xf32>, vector<32x32xf32> -> vector<32x32xf32>
    %27 = arith.subf %24, %26 : vector<32x32xf32>
    %c0_12 = arith.constant 0 : index
    %c0_13 = arith.constant 0 : index
    %28 = vector.load %arg4[%c0_12, %c0_13] : memref<32x32xf32, #tpu.memory_space<vmem>>, vector<32x32xf32>
    tpu.vector_store %arg4[%c0_12, %c0_13], %27 {strides = array<i32>} : memref<32x32xf32, #tpu.memory_space<vmem>>, vector<32x32xf32>,
    return
  }
}

module attributes {stable_mosaic.version = 11 : i64} {
  func.func @_dec_a_kernel(%arg0: memref<32x32xf32, #tpu.memory_space<vmem>>, %arg1: memref<32x32xf32, #tpu.memory_space<vmem>>, %arg2: memref<32x32xf32, #tpu.memory_space<vmem>>, %arg3: memref<32x32xf32, #tpu.memory_space<vmem>>, %arg4: memref<32x32xf32, #tpu.memory_space<vmem>>, %arg5: memref<1x32xf32, #tpu.memory_space<vmem>>, %arg6: memref<32x32xf32, #tpu.memory_space<vmem>>, %arg7: memref<1x32xf32, #tpu.memory_space<vmem>>, %arg8: memref<32x64xf32, #tpu.memory_space<vmem>>, %arg9: memref<1x64xf32, #tpu.memory_space<vmem>>, %arg10: memref<32x32xf32, #tpu.memory_space<vmem>>, %arg11: memref<32x32xf32, #tpu.memory_space<vmem>>, %arg12: memref<32x32xf32, #tpu.memory_space<vmem>>, %arg13: memref<32x64xf32, #tpu.memory_space<vmem>>) attributes {dimension_semantics = [], scalar_prefetch = 0 : i64, scratch_operands = 0 : i64, tpu.core_type = #tpu.core_type<tc>} {
    %c0 = arith.constant 0 : index
    %c0_0 = arith.constant 0 : index
    %0 = vector.load %arg2[%c0, %c0_0] : memref<32x32xf32, #tpu.memory_space<vmem>>, vector<32x32xf32>
    %c0_1 = arith.constant 0 : index
    %c0_2 = arith.constant 0 : index
    %1 = vector.load %arg1[%c0_1, %c0_2] : memref<32x32xf32, #tpu.memory_space<vmem>>, vector<32x32xf32>
    %c0_3 = arith.constant 0 : index
    %c0_4 = arith.constant 0 : index
    %2 = vector.load %arg4[%c0_3, %c0_4] : memref<32x32xf32, #tpu.memory_space<vmem>>, vector<32x32xf32>
    %cst = arith.constant dense<0.000000e+00> : vector<32x32xf32>
    %3 = tpu.matmul %1, %2, %cst {dimension_numbers = #tpu.dot_dimension_numbers<[1], [0], [0], [1], [0, 0, 1, 1], [], []>} : vector<32x32xf32>, vector<32x32xf32>, vector<32x32xf32> -> vector<32x32xf32>
    %4 = arith.addf %0, %3 : vector<32x32xf32>
    %c0_5 = arith.constant 0 : index
    %c0_6 = arith.constant 0 : index
    %5 = vector.load %arg5[%c0_5, %c0_6] : memref<1x32xf32, #tpu.memory_space<vmem>>, vector<1x32xf32>
    %6 = vector.broadcast %5 : vector<1x32xf32> to vector<32x32xf32>
    %7 = arith.addf %4, %6 : vector<32x32xf32>
    %c0_7 = arith.constant 0 : index
    %c0_8 = arith.constant 0 : index
    %8 = vector.load %arg0[%c0_7, %c0_8] : memref<32x32xf32, #tpu.memory_space<vmem>>, vector<32x32xf32>
    %cst_9 = arith.constant dense<0.000000e+00> : vector<32x32xf32>
    %9 = tpu.matmul %8, %7, %cst_9 {dimension_numbers = #tpu.dot_dimension_numbers<[1], [0], [0], [1], [0, 0, 1, 1], [], []>} : vector<32x32xf32>, vector<32x32xf32>, vector<32x32xf32> -> vector<32x32xf32>
    %10 = arith.subf %7, %9 : vector<32x32xf32>
    %c0_10 = arith.constant 0 : index
    %c0_11 = arith.constant 0 : index
    %11 = vector.load %arg10[%c0_10, %c0_11] : memref<32x32xf32, #tpu.memory_space<vmem>>, vector<32x32xf32>
    tpu.vector_store %arg10[%c0_10, %c0_11], %10 {strides = array<i32>} : memref<32x32xf32, #tpu.memory_space<vmem>>, vector<32x32xf32>,
    %c0_12 = arith.constant 0 : index
    %c0_13 = arith.constant 0 : index
    %12 = vector.load %arg11[%c0_12, %c0_13] : memref<32x32xf32, #tpu.memory_space<vmem>>, vector<32x32xf32>
    tpu.vector_store %arg11[%c0_12, %c0_13], %9 {strides = array<i32>} : memref<32x32xf32, #tpu.memory_space<vmem>>, vector<32x32xf32>,
    %c0_14 = arith.constant 0 : index
    %c0_15 = arith.constant 0 : index
    %13 = vector.load %arg6[%c0_14, %c0_15] : memref<32x32xf32, #tpu.memory_space<vmem>>, vector<32x32xf32>
    %cst_16 = arith.constant dense<0.000000e+00> : vector<32x32xf32>
    %14 = tpu.matmul %10, %13, %cst_16 {dimension_numbers = #tpu.dot_dimension_numbers<[1], [0], [0], [1], [0, 0, 1, 1], [], []>} : vector<32x32xf32>, vector<32x32xf32>, vector<32x32xf32> -> vector<32x32xf32>
    %c0_17 = arith.constant 0 : index
    %c0_18 = arith.constant 0 : index
    %15 = vector.load %arg7[%c0_17, %c0_18] : memref<1x32xf32, #tpu.memory_space<vmem>>, vector<1x32xf32>
    %16 = vector.broadcast %15 : vector<1x32xf32> to vector<32x32xf32>
    %17 = arith.addf %14, %16 : vector<32x32xf32>
    %c0_19 = arith.constant 0 : index
    %c0_20 = arith.constant 0 : index
    %18 = vector.load %arg12[%c0_19, %c0_20] : memref<32x32xf32, #tpu.memory_space<vmem>>, vector<32x32xf32>
    tpu.vector_store %arg12[%c0_19, %c0_20], %17 {strides = array<i32>} : memref<32x32xf32, #tpu.memory_space<vmem>>, vector<32x32xf32>,
    %c0_21 = arith.constant 0 : index
    %c0_22 = arith.constant 0 : index
    %19 = vector.load %arg3[%c0_21, %c0_22] : memref<32x32xf32, #tpu.memory_space<vmem>>, vector<32x32xf32>
    %c0_23 = arith.constant 0 : index
    %c0_24 = arith.constant 0 : index
    %20 = vector.load %arg8[%c0_23, %c0_24] : memref<32x64xf32, #tpu.memory_space<vmem>>, vector<32x64xf32>
    %cst_25 = arith.constant dense<0.000000e+00> : vector<32x64xf32>
    %21 = tpu.matmul %19, %20, %cst_25 {dimension_numbers = #tpu.dot_dimension_numbers<[1], [0], [0], [1], [0, 0, 1, 1], [], []>} : vector<32x32xf32>, vector<32x64xf32>, vector<32x64xf32> -> vector<32x64xf32>
    %c0_26 = arith.constant 0 : index
    %c0_27 = arith.constant 0 : index
    %22 = vector.load %arg9[%c0_26, %c0_27] : memref<1x64xf32, #tpu.memory_space<vmem>>, vector<1x64xf32>
    %23 = vector.broadcast %22 : vector<1x64xf32> to vector<32x64xf32>
    %24 = arith.addf %21, %23 : vector<32x64xf32>
    %c0_28 = arith.constant 0 : index
    %c0_29 = arith.constant 0 : index
    %25 = vector.load %arg13[%c0_28, %c0_29] : memref<32x64xf32, #tpu.memory_space<vmem>>, vector<32x64xf32>
    tpu.vector_store %arg13[%c0_28, %c0_29], %24 {strides = array<i32>} : memref<32x64xf32, #tpu.memory_space<vmem>>, vector<32x64xf32>,
    return
  }
}

module attributes {stable_mosaic.version = 11 : i64} {
  func.func @_dec_b_kernel(%arg0: memref<32x32xf32, #tpu.memory_space<vmem>>, %arg1: memref<32x32xf32, #tpu.memory_space<vmem>>, %arg2: memref<32x32xf32, #tpu.memory_space<vmem>>, %arg3: memref<32x32xf32, #tpu.memory_space<vmem>>, %arg4: memref<32x32xf32, #tpu.memory_space<vmem>>, %arg5: memref<32x32xf32, #tpu.memory_space<vmem>>, %arg6: memref<32x1xf32, #tpu.memory_space<vmem>>, %arg7: memref<32x32xf32, #tpu.memory_space<vmem>>, %arg8: memref<1x32xf32, #tpu.memory_space<vmem>>, %arg9: memref<32x128xf32, #tpu.memory_space<vmem>>, %arg10: memref<128x32xf32, #tpu.memory_space<vmem>>, %arg11: memref<96x1xf32, #tpu.memory_space<vmem>>, %arg12: memref<32x32xf32, #tpu.memory_space<vmem>>, %arg13: memref<32x1xf32, #tpu.memory_space<vmem>>) attributes {dimension_semantics = [], scalar_prefetch = 0 : i64, scratch_operands = 0 : i64, tpu.core_type = #tpu.core_type<tc>} {
    %c0 = arith.constant 0 : index
    %c0_0 = arith.constant 0 : index
    %0 = vector.load %arg0[%c0, %c0_0] : memref<32x32xf32, #tpu.memory_space<vmem>>, vector<32x32xf32>
    %c0_1 = arith.constant 0 : index
    %c0_2 = arith.constant 0 : index
    %1 = vector.load %arg4[%c0_1, %c0_2] : memref<32x32xf32, #tpu.memory_space<vmem>>, vector<32x32xf32>
    %c0_3 = arith.constant 0 : index
    %c0_4 = arith.constant 0 : index
    %2 = vector.load %arg3[%c0_3, %c0_4] : memref<32x32xf32, #tpu.memory_space<vmem>>, vector<32x32xf32>
    %c0_5 = arith.constant 0 : index
    %c0_6 = arith.constant 0 : index
    %3 = vector.load %arg7[%c0_5, %c0_6] : memref<32x32xf32, #tpu.memory_space<vmem>>, vector<32x32xf32>
    %cst = arith.constant dense<0.000000e+00> : vector<32x32xf32>
    %4 = tpu.matmul %2, %3, %cst {dimension_numbers = #tpu.dot_dimension_numbers<[1], [0], [0], [1], [0, 0, 1, 1], [], []>} : vector<32x32xf32>, vector<32x32xf32>, vector<32x32xf32> -> vector<32x32xf32>
    %5 = arith.addf %1, %4 : vector<32x32xf32>
    %c0_7 = arith.constant 0 : index
    %c0_8 = arith.constant 0 : index
    %6 = vector.load %arg8[%c0_7, %c0_8] : memref<1x32xf32, #tpu.memory_space<vmem>>, vector<1x32xf32>
    %7 = vector.broadcast %6 : vector<1x32xf32> to vector<32x32xf32>
    %8 = arith.addf %5, %7 : vector<32x32xf32>
    %cst_9 = arith.constant dense<0.000000e+00> : vector<32x32xf32>
    %9 = tpu.matmul %0, %8, %cst_9 {dimension_numbers = #tpu.dot_dimension_numbers<[1], [0], [0], [1], [0, 0, 1, 1], [], []>} : vector<32x32xf32>, vector<32x32xf32>, vector<32x32xf32> -> vector<32x32xf32>
    %10 = arith.subf %8, %9 : vector<32x32xf32>
    %c0_10 = arith.constant 0 : index
    %c0_11 = arith.constant 0 : index
    %11 = vector.load %arg9[%c0_10, %c0_11] : memref<32x128xf32, #tpu.memory_space<vmem>>, vector<32x128xf32>
    %cst_12 = arith.constant dense<0.000000e+00> : vector<32x128xf32>
    %12 = tpu.matmul %10, %11, %cst_12 {dimension_numbers = #tpu.dot_dimension_numbers<[1], [0], [0], [1], [0, 0, 1, 1], [], []>} : vector<32x32xf32>, vector<32x128xf32>, vector<32x128xf32> -> vector<32x128xf32>
    %cst_13 = arith.constant 5.000000e-01 : f32
    %13 = vector.broadcast %cst_13 : f32 to vector<32x128xf32>
    %14 = arith.mulf %13, %12 : vector<32x128xf32>
    %cst_14 = arith.constant 0.707106769 : f32
    %15 = vector.broadcast %cst_14 : f32 to vector<32x128xf32>
    %16 = arith.mulf %12, %15 : vector<32x128xf32>
    %17 = math.erf %16 : vector<32x128xf32>
    %cst_15 = arith.constant 1.000000e+00 : f32
    %18 = vector.broadcast %cst_15 : f32 to vector<32x128xf32>
    %19 = arith.addf %18, %17 : vector<32x128xf32>
    %20 = arith.mulf %14, %19 : vector<32x128xf32>
    %c0_16 = arith.constant 0 : index
    %c0_17 = arith.constant 0 : index
    %21 = vector.load %arg10[%c0_16, %c0_17] : memref<128x32xf32, #tpu.memory_space<vmem>>, vector<128x32xf32>
    %cst_18 = arith.constant dense<0.000000e+00> : vector<32x32xf32>
    %22 = tpu.matmul %20, %21, %cst_18 {dimension_numbers = #tpu.dot_dimension_numbers<[1], [0], [0], [1], [0, 0, 1, 1], [], []>} : vector<32x128xf32>, vector<128x32xf32>, vector<32x32xf32> -> vector<32x32xf32>
    %23 = arith.addf %10, %22 : vector<32x32xf32>
    %cst_19 = arith.constant dense<0.000000e+00> : vector<32x32xf32>
    %24 = tpu.matmul %0, %23, %cst_19 {dimension_numbers = #tpu.dot_dimension_numbers<[1], [0], [0], [1], [0, 0, 1, 1], [], []>} : vector<32x32xf32>, vector<32x32xf32>, vector<32x32xf32> -> vector<32x32xf32>
    %25 = arith.subf %23, %24 : vector<32x32xf32>
    %c0_20 = arith.constant 0 : index
    %c0_21 = arith.constant 0 : index
    %26 = vector.load %arg12[%c0_20, %c0_21] : memref<32x32xf32, #tpu.memory_space<vmem>>, vector<32x32xf32>
    tpu.vector_store %arg12[%c0_20, %c0_21], %25 {strides = array<i32>} : memref<32x32xf32, #tpu.memory_space<vmem>>, vector<32x32xf32>,
    %c0_22 = arith.constant 0 : index
    %c0_23 = arith.constant 0 : index
    %27 = vector.load %arg5[%c0_22, %c0_23] : memref<32x32xf32, #tpu.memory_space<vmem>>, vector<32x32xf32>
    %28 = arith.addf %27, %9 : vector<32x32xf32>
    %29 = arith.addf %28, %24 : vector<32x32xf32>
    %c0_24 = arith.constant 0 : index
    %c0_25 = arith.constant 0 : index
    %30 = vector.load %arg11[%c0_24, %c0_25] : memref<96x1xf32, #tpu.memory_space<vmem>>, vector<96x1xf32>
    %c0_26 = arith.constant 0 : index
    %c0_27 = arith.constant 0 : index
    %31 = vector.load %arg1[%c0_26, %c0_27] : memref<32x32xf32, #tpu.memory_space<vmem>>, vector<32x32xf32>
    %cst_28 = arith.constant dense<0.000000e+00> : vector<32x32xf32>
    %32 = tpu.matmul %31, %29, %cst_28 {dimension_numbers = #tpu.dot_dimension_numbers<[1], [0], [0], [1], [0, 0, 1, 1], [], []>} : vector<32x32xf32>, vector<32x32xf32>, vector<32x32xf32> -> vector<32x32xf32>
    %33 = vector.extract_strided_slice %30 {offsets = [0, 0], sizes = [32, 1], strides = [1, 1]} : vector<96x1xf32> to vector<32x1xf32>
    %cst_29 = arith.constant dense<0.000000e+00> : vector<32x1xf32>
    %34 = tpu.matmul %32, %33, %cst_29 {dimension_numbers = #tpu.dot_dimension_numbers<[1], [0], [0], [1], [0, 0, 1, 1], [], []>} : vector<32x32xf32>, vector<32x1xf32>, vector<32x1xf32> -> vector<32x1xf32>
    %35 = vector.extract_strided_slice %30 {offsets = [32, 0], sizes = [32, 1], strides = [1, 1]} : vector<96x1xf32> to vector<32x1xf32>
    %cst_30 = arith.constant dense<0.000000e+00> : vector<32x1xf32>
    %36 = tpu.matmul %29, %35, %cst_30 {dimension_numbers = #tpu.dot_dimension_numbers<[1], [0], [0], [1], [0, 0, 1, 1], [], []>} : vector<32x32xf32>, vector<32x1xf32>, vector<32x1xf32> -> vector<32x1xf32>
    %37 = arith.addf %34, %36 : vector<32x1xf32>
    %c0_31 = arith.constant 0 : index
    %c0_32 = arith.constant 0 : index
    %38 = vector.load %arg2[%c0_31, %c0_32] : memref<32x32xf32, #tpu.memory_space<vmem>>, vector<32x32xf32>
    %cst_33 = arith.constant dense<0.000000e+00> : vector<32x32xf32>
    %39 = tpu.matmul %38, %29, %cst_33 {dimension_numbers = #tpu.dot_dimension_numbers<[1], [0], [0], [1], [0, 0, 1, 1], [], []>} : vector<32x32xf32>, vector<32x32xf32>, vector<32x32xf32> -> vector<32x32xf32>
    %40 = vector.extract_strided_slice %30 {offsets = [64, 0], sizes = [32, 1], strides = [1, 1]} : vector<96x1xf32> to vector<32x1xf32>
    %cst_34 = arith.constant dense<0.000000e+00> : vector<32x1xf32>
    %41 = tpu.matmul %39, %40, %cst_34 {dimension_numbers = #tpu.dot_dimension_numbers<[1], [0], [0], [1], [0, 0, 1, 1], [], []>} : vector<32x32xf32>, vector<32x1xf32>, vector<32x1xf32> -> vector<32x1xf32>
    %42 = arith.addf %37, %41 : vector<32x1xf32>
    %c0_35 = arith.constant 0 : index
    %c0_36 = arith.constant 0 : index
    %43 = vector.load %arg6[%c0_35, %c0_36] : memref<32x1xf32, #tpu.memory_space<vmem>>, vector<32x1xf32>
    %44 = arith.addf %43, %42 : vector<32x1xf32>
    %c0_37 = arith.constant 0 : index
    %c0_38 = arith.constant 0 : index
    %45 = vector.load %arg13[%c0_37, %c0_38] : memref<32x1xf32, #tpu.memory_space<vmem>>, vector<32x1xf32>
    tpu.vector_store %arg13[%c0_37, %c0_38], %44 {strides = array<i32>} : memref<32x1xf32, #tpu.memory_space<vmem>>, vector<32x1xf32>,
    return
  }
}

module attributes {stable_mosaic.version = 11 : i64} {
  func.func @_dec_final_kernel(%arg0: memref<32x32xf32, #tpu.memory_space<vmem>>, %arg1: memref<32x32xf32, #tpu.memory_space<vmem>>, %arg2: memref<1x32xf32, #tpu.memory_space<vmem>>, %arg3: memref<1x32xf32, #tpu.memory_space<vmem>>, %arg4: memref<32x1xf32, #tpu.memory_space<vmem>>, %arg5: memref<1x1xf32, #tpu.memory_space<vmem>>, %arg6: memref<32x1xf32, #tpu.memory_space<vmem>>, %arg7: memref<32x1xf32, #tpu.memory_space<vmem>>) attributes {dimension_semantics = [], scalar_prefetch = 0 : i64, scratch_operands = 0 : i64, tpu.core_type = #tpu.core_type<tc>} {
    %c0 = arith.constant 0 : index
    %c0_0 = arith.constant 0 : index
    %0 = vector.load %arg1[%c0, %c0_0] : memref<32x32xf32, #tpu.memory_space<vmem>>, vector<32x32xf32>
    %cst = arith.constant dense<0.000000e+00> : vector<32xf32>
    %1 = vector.multi_reduction <add>, %0, %cst [1] : vector<32x32xf32> to vector<32xf32>
    %2 = vector.shape_cast %1 : vector<32xf32> to vector<32x1xf32>
    %cst_1 = arith.constant 3.200000e+01 : f32
    %3 = vector.broadcast %cst_1 : f32 to vector<32x1xf32>
    %4 = arith.divf %2, %3 : vector<32x1xf32>
    %5 = vector.broadcast %4 : vector<32x1xf32> to vector<32x32xf32>
    %6 = arith.subf %0, %5 : vector<32x32xf32>
    %7 = arith.mulf %6, %6 : vector<32x32xf32>
    %cst_2 = arith.constant dense<0.000000e+00> : vector<32xf32>
    %8 = vector.multi_reduction <add>, %7, %cst_2 [1] : vector<32x32xf32> to vector<32xf32>
    %9 = vector.shape_cast %8 : vector<32xf32> to vector<32x1xf32>
    %cst_3 = arith.constant 3.200000e+01 : f32
    %10 = vector.broadcast %cst_3 : f32 to vector<32x1xf32>
    %11 = arith.divf %9, %10 : vector<32x1xf32>
    %12 = vector.broadcast %4 : vector<32x1xf32> to vector<32x32xf32>
    %13 = arith.subf %0, %12 : vector<32x32xf32>
    %cst_4 = arith.constant 9.99999974E-6 : f32
    %14 = vector.broadcast %cst_4 : f32 to vector<32x1xf32>
    %15 = arith.addf %11, %14 : vector<32x1xf32>
    %16 = math.rsqrt %15 : vector<32x1xf32>
    %17 = vector.broadcast %16 : vector<32x1xf32> to vector<32x32xf32>
    %18 = arith.mulf %13, %17 : vector<32x32xf32>
    %c0_5 = arith.constant 0 : index
    %c0_6 = arith.constant 0 : index
    %19 = vector.load %arg2[%c0_5, %c0_6] : memref<1x32xf32, #tpu.memory_space<vmem>>, vector<1x32xf32>
    %20 = vector.broadcast %19 : vector<1x32xf32> to vector<32x32xf32>
    %21 = arith.mulf %18, %20 : vector<32x32xf32>
    %c0_7 = arith.constant 0 : index
    %c0_8 = arith.constant 0 : index
    %22 = vector.load %arg3[%c0_7, %c0_8] : memref<1x32xf32, #tpu.memory_space<vmem>>, vector<1x32xf32>
    %23 = vector.broadcast %22 : vector<1x32xf32> to vector<32x32xf32>
    %24 = arith.addf %21, %23 : vector<32x32xf32>
    %c0_9 = arith.constant 0 : index
    %c0_10 = arith.constant 0 : index
    %25 = vector.load %arg0[%c0_9, %c0_10] : memref<32x32xf32, #tpu.memory_space<vmem>>, vector<32x32xf32>
    %cst_11 = arith.constant dense<0.000000e+00> : vector<32x32xf32>
    %26 = tpu.matmul %25, %24, %cst_11 {dimension_numbers = #tpu.dot_dimension_numbers<[1], [0], [0], [1], [0, 0, 1, 1], [], []>} : vector<32x32xf32>, vector<32x32xf32>, vector<32x32xf32> -> vector<32x32xf32>
    %27 = arith.subf %24, %26 : vector<32x32xf32>
    %c0_12 = arith.constant 0 : index
    %c0_13 = arith.constant 0 : index
    %28 = vector.load %arg6[%c0_12, %c0_13] : memref<32x1xf32, #tpu.memory_space<vmem>>, vector<32x1xf32>
    %c0_14 = arith.constant 0 : index
    %c0_15 = arith.constant 0 : index
    %29 = vector.load %arg4[%c0_14, %c0_15] : memref<32x1xf32, #tpu.memory_space<vmem>>, vector<32x1xf32>
    %cst_16 = arith.constant dense<0.000000e+00> : vector<32x1xf32>
    %30 = tpu.matmul %27, %29, %cst_16 {dimension_numbers = #tpu.dot_dimension_numbers<[1], [0], [0], [1], [0, 0, 1, 1], [], []>} : vector<32x32xf32>, vector<32x1xf32>, vector<32x1xf32> -> vector<32x1xf32>
    %31 = arith.addf %28, %30 : vector<32x1xf32>
    %c0_17 = arith.constant 0 : index
    %c0_18 = arith.constant 0 : index
    %32 = vector.load %arg5[%c0_17, %c0_18] : memref<1x1xf32, #tpu.memory_space<vmem>>, vector<1x1xf32>
    %33 = vector.broadcast %32 : vector<1x1xf32> to vector<32x1xf32>
    %34 = arith.addf %31, %33 : vector<32x1xf32>
    %c0_19 = arith.constant 0 : index
    %c0_20 = arith.constant 0 : index
    %35 = vector.load %arg7[%c0_19, %c0_20] : memref<32x1xf32, #tpu.memory_space<vmem>>, vector<32x1xf32>
    tpu.vector_store %arg7[%c0_19, %c0_20], %34 {strides = array<i32>} : memref<32x1xf32, #tpu.memory_space<vmem>>, vector<32x1xf32>,
    return
  }
}

</mosaic_0001>

<bundles_post_ra>
// kernel: _lambda_.17
= control target key start
LH: loop header
LB: loop body
LE: loop exit
PB: predicated region body
PF: predicated region fallthrough
CT: control target
= control target key end

     0   :  { %vm29_vm0 = vcmask 261120   ;;  %vm127_vm1 = vcmask 785408   ;;  %s238_s1 = inlined_call_operand.vmem [shape: f32[32,96], index: 1, kind: input, shape index: {}]   ;;  %s239_s0 = inlined_call_operand.vmem [shape: f32[32,32], index: 0, kind: input, shape index: {}]   ;;  %s240_s2 = inlined_call_operand.vmem [shape: f32[1,96], index: 2, kind: input, shape index: {}]   ;;  %s241_s3 = inlined_call_operand.vmem [shape: f32[32,96], index: 3, kind: output, shape index: {}]  }
   0x1   :  { %v18_v0 = vld [vmem:[%s238_s1] sm:$0xff]  ;;  %v19_v1 = vld [vmem:[%s238_s1 + $0x8] sm:$0xff]  ;;  %v20_v2 = vld [vmem:[%s238_s1 + $0x10] sm:$0xff] }
   0x2   :  { %v163_v3 = vpack.c.bf16 %v19_v1, %v18_v0  ;;  %v21_v4 = vld [vmem:[%s238_s1 + $0x18] sm:$0xff]  ;;  %v14_v5 = vld [vmem:[%s239_s0] sm:$0xff]  ;;  %v16_v6 = vld [vmem:[%s239_s0 + $0x10] sm:$0xff] }
   0x3   :  { %v167_v7 = vpack.c.bf16 %v21_v4, %v20_v2  ;;  %157 = vmatprep.mubr.msk.f32.mxu0 %vm29_vm0, %v14_v5  ;;  %160 = vmatprep.mubr.msk.f32.mxu1 %vm29_vm0, %v16_v6  ;;  %v15_v8 = vld [vmem:[%s239_s0 + $0x8] sm:$0xff]  ;;  %v17_v9 = vld [vmem:[%s239_s0 + $0x18] sm:$0xff]  ;;  %v136_v10 = vld [vmem:[%s240_s2] ss:$0 sm:$0xff] }
   0x4   :  { %164 = vmatprep.subr.bf16.mxu0 %v163_v3  ;;  %171 = vmatprep.subr.bf16.mxu1 %v163_v3 }
   0x5   :  { %166 = vmatpush3.bf16.msra.mxu0 %v163_v3  ;;  %173 = vmatpush3.bf16.msra.mxu1 %v163_v3 }
   0x6   :  { %168 = vmatprep.subr.bf16.mxu0 %v167_v7  ;;  %172 = vmatprep.subr.bf16.mxu1 %v167_v7 }
   0x9   :  { %170 = vmatpush3.bf16.msra.mxu0 %v167_v7  ;;  %174 = vmatpush3.bf16.msra.mxu1 %v167_v7 }
   0xc   :  { %158 = vmatmul.mubr.msk.f32.vlgmr.msra.gmra.mrb[0].mxu0 %vm29_vm0, %v15_v8  ;;  %161 = vmatmul.mubr.msk.f32.vlgmr.msra.gmra.mrb[0].mxu1 %vm29_vm0, %v17_v9 }
  0xdf   :  { %v159_v11 = vpop.f32.mrb[0].mxu0  ;;  %v162_v12 = vpop.f32.mrb[0].mxu1 }
  0xe0   :  { %v114_v13 = vadd.f32 %v159_v11, %v136_v10  ;;  %v124_v14 = vadd.f32 %v162_v12, %v136_v10  ;;  %v108_v15 = vpop.f32.mrb[1].mxu0  ;;  %v118_v16 = vpop.f32.mrb[1].mxu1 }
  0xe1   :  { %v109_v17 = vadd.f32 %v136_v10, %v108_v15  ;;  %v119_v18 = vadd.f32 %v136_v10, %v118_v16 }
  0xe2   :  { %129 = vst.msk [vmem:[%s241_s3 + $0x8] sm:$0xff] %vm127_vm1, %v114_v13  ;;  %131 = vst.msk [vmem:[%s241_s3 + $0x18] sm:$0xff] %vm127_vm1, %v124_v14 }
  0xe3   :  { %128 = vst.msk [vmem:[%s241_s3] sm:$0xff] %vm127_vm1, %v109_v17  ;;  %130 = vst.msk [vmem:[%s241_s3 + $0x10] sm:$0xff] %vm127_vm1, %v119_v18 }

// kernel: _lambda_.15
= control target key start
LH: loop header
LB: loop body
LE: loop exit
PB: predicated region body
PF: predicated region fallthrough
CT: control target
= control target key end

     0   :  { %vm21_vm0 = vcmask 261120   ;;  %vm119_vm1 = vcmask 7168   ;;  %s258_s1 = inlined_call_operand.vmem [shape: f32[32,1], index: 1, kind: input, shape index: {}]   ;;  %s259_s0 = inlined_call_operand.vmem [shape: f32[32,32], index: 0, kind: input, shape index: {}]   ;;  %s260_s3 = inlined_call_operand.vmem [shape: f32[32,1], index: 3, kind: output, shape index: {1}]   ;;  %s261_s2 = inlined_call_operand.vmem [shape: f32[32,1], index: 2, kind: output, shape index: {0}]  }
   0x1   :  { %v13_v0 = vld [vmem:[%s258_s1] sm:$0xff]  ;;  %v14_v1 = vld [vmem:[%s258_s1 + $0x8] sm:$0xff]  ;;  %v15_v2 = vld [vmem:[%s258_s1 + $0x10] sm:$0xff] }
   0x2   :  { %v166_v3 = vpack.c.bf16 %v14_v1, %v13_v0  ;;  %v16_v4 = vld [vmem:[%s258_s1 + $0x18] sm:$0xff]  ;;  %v17_v5 = vld [vmem:[%s259_s0] sm:$0xff]  ;;  %v19_v6 = vld [vmem:[%s259_s0 + $0x10] sm:$0xff] }
   0x3   :  { %v170_v7 = vpack.c.bf16 %v16_v4, %v15_v2  ;;  %160 = vmatprep.mubr.msk.f32.mxu0 %vm21_vm0, %v17_v5  ;;  %163 = vmatprep.mubr.msk.f32.mxu1 %vm21_vm0, %v19_v6  ;;  %v18_v8 = vld [vmem:[%s259_s0 + $0x8] sm:$0xff]  ;;  %v20_v9 = vld [vmem:[%s259_s0 + $0x18] sm:$0xff] }
   0x4   :  { %167 = vmatprep.subr.bf16.mxu0 %v166_v3  ;;  %174 = vmatprep.subr.bf16.mxu1 %v166_v3 }
   0x5   :  { %169 = vmatpush3.bf16.msra.mxu0 %v166_v3  ;;  %176 = vmatpush3.bf16.msra.mxu1 %v166_v3 }
   0x6   :  { %171 = vmatprep.subr.bf16.mxu0 %v170_v7  ;;  %175 = vmatprep.subr.bf16.mxu1 %v170_v7 }
   0x9   :  { %173 = vmatpush3.bf16.msra.mxu0 %v170_v7  ;;  %177 = vmatpush3.bf16.msra.mxu1 %v170_v7 }
   0xc   :  { %161 = vmatmul.mubr.msk.f32.vlgmr.msra.gmra.mrb[0].mxu0 %vm21_vm0, %v18_v8  ;;  %164 = vmatmul.mubr.msk.f32.vlgmr.msra.gmra.mrb[0].mxu1 %vm21_vm0, %v20_v9 }
  0xdf   :  { %v162_v10 = vpop.f32.mrb[0].mxu0  ;;  %v165_v11 = vpop.f32.mrb[0].mxu1 }
  0xe0   :  { %121 = vst.msk [vmem:[%s260_s3 + $0x8] sm:$0xff] %vm119_vm1, %v162_v10  ;;  %v125_v12 = vsub.f32 %v14_v1, %v162_v10  ;;  %123 = vst.msk [vmem:[%s260_s3 + $0x18] sm:$0xff] %vm119_vm1, %v165_v11  ;;  %v127_v13 = vsub.f32 %v16_v4, %v165_v11  ;;  %v100_v14 = vpop.f32.mrb[1].mxu0  ;;  %v110_v15 = vpop.f32.mrb[1].mxu1 }
  0xe1   :  { %120 = vst.msk [vmem:[%s260_s3] sm:$0xff] %vm119_vm1, %v100_v14  ;;  %v124_v16 = vsub.f32 %v13_v0, %v100_v14  ;;  %122 = vst.msk [vmem:[%s260_s3 + $0x10] sm:$0xff] %vm119_vm1, %v110_v15  ;;  %v126_v17 = vsub.f32 %v15_v2, %v110_v15 }
  0xe2   :  { %129 = vst.msk [vmem:[%s261_s2 + $0x8] sm:$0xff] %vm119_vm1, %v125_v12  ;;  %131 = vst.msk [vmem:[%s261_s2 + $0x18] sm:$0xff] %vm119_vm1, %v127_v13 }
  0xe3   :  { %128 = vst.msk [vmem:[%s261_s2] sm:$0xff] %vm119_vm1, %v124_v16  ;;  %130 = vst.msk [vmem:[%s261_s2 + $0x10] sm:$0xff] %vm119_vm1, %v126_v17 }

// kernel: _lambda_.16
= control target key start
LH: loop header
LB: loop body
LE: loop exit
PB: predicated region body
PF: predicated region fallthrough
CT: control target
= control target key end

     0   :  { %vm31_vm0 = vcmask 261120   ;;  %v413_v3 = vmov 0   ;;  %s518_s2 = inlined_call_operand.vmem [shape: f32[32,1], index: 2, kind: input, shape index: {}]   ;;  %s519_s0 = inlined_call_operand.vmem [shape: f32[32,32], index: 0, kind: input, shape index: {}]   ;;  %s520_s1 = inlined_call_operand.vmem [shape: f32[32,32], index: 1, kind: input, shape index: {}]   ;;  %s521_s4 = inlined_call_operand.vmem [shape: f32[1,32], index: 4, kind: input, shape index: {}]   ;;  %s522_s3 = inlined_call_operand.vmem [shape: f32[1,32], index: 3, kind: input, shape index: {}]   ;;  %s523_s5 = inlined_call_operand.vmem [shape: f32[1,32], index: 5, kind: input, shape index: {}]   ;;  %s524_s6 = inlined_call_operand.vmem [shape: f32[32,32], index: 6, kind: output, shape index: {}]  }
   0x1   :  { %v23_v0 = vld [vmem:[%s518_s2] sm:$0xff]  ;;  %v24_v1 = vld [vmem:[%s518_s2 + $0x8] sm:$0xff]  ;;  %v25_v2 = vld [vmem:[%s518_s2 + $0x10] sm:$0xff]  ;;  %412 = vset.pattern.permute.xlu1 %v413_v3  ;;  %411 = vset.pattern.permute.xlu0 %v413_v3 }
   0x2   :  { %v394_v4 = vpack.c.bf16 %v24_v1, %v23_v0  ;;  %v26_v5 = vld [vmem:[%s518_s2 + $0x18] sm:$0xff]  ;;  %v27_v6 = vld [vmem:[%s519_s0] sm:$0xff]  ;;  %269 = vperm.xlu1 %412, %v24_v1   ;;  %264 = vperm.xlu0 %411, %v23_v0   ;;  %v28_v9 = vld [vmem:[%s519_s0 + $0x8] sm:$0xff] }
   0x3   :  { %v129_v7 = vld [vmem:[%s520_s1] sm:$0xff]  ;;  %v398_v8 = vpack.c.bf16 %v26_v5, %v25_v2  ;;  %374 = vmatprep.mubr.msk.f32.mxu0 %vm31_vm0, %v27_v6  ;;  %v130_v10 = vld [vmem:[%s520_s1 + $0x8] sm:$0xff]  ;;  %v29_v11 = vld [vmem:[%s519_s0 + $0x10] sm:$0xff] }
   0x4   :  { %388 = vmatprep.mubr.msk.f32.mxu1 %vm31_vm0, %v129_v7  ;;  %395 = vmatprep.subr.bf16.mxu0 %v394_v4  ;;  %v131_v12 = vld [vmem:[%s520_s1 + $0x10] sm:$0xff]  ;;  %v30_v13 = vld [vmem:[%s519_s0 + $0x18] sm:$0xff]  ;;  %v348_v27 = vld [vmem:[%s521_s4] ss:$0 sm:$0xff] }
   0x5   :  { %403 = vmatprep.subr.bf16.mxu1 %v394_v4  ;;  %397 = vmatpush3.bf16.msra.mxu0 %v394_v4  ;;  %v132_v14 = vld [vmem:[%s520_s1 + $0x18] sm:$0xff]  ;;  %v347_v28 = vld [vmem:[%s522_s3] ss:$0 sm:$0xff] }
   0x6   :  { %405 = vmatpush3.bf16.msra.mxu1 %v394_v4  ;;  %399 = vmatprep.subr.bf16.mxu0 %v398_v8  ;;  %v349_v29 = vld [vmem:[%s523_s5] ss:$0 sm:$0xff] }
   0x7   :  { %407 = vmatprep.subr.bf16.mxu1 %v398_v8  ;;  %279 = vperm.xlu1 %412, %v26_v5  }
   0x8   :  { %274 = vperm.xlu0 %411, %v25_v2  }
   0x9   :  { %401 = vmatpush3.bf16.msra.mxu0 %v398_v8 }
   0xa   :  { %409 = vmatpush3.bf16.msra.mxu1 %v398_v8 }
   0xc   :  { %375 = vmatmul.mubr.msk.f32.vlgmr.msra.gmra.mrb[0].mxu0 %vm31_vm0, %v28_v9 }
   0xd   :  { %389 = vmatmul.mubr.msk.f32.vlgmr.msra.gmra.mrb[0].mxu1 %vm31_vm0, %v130_v10  ;;  %377 = vmatprep.mubr.msk.f32.mxu0 %vm31_vm0, %v29_v11 }
   0xe   :  { %391 = vmatprep.mubr.msk.f32.mxu1 %vm31_vm0, %v131_v12 }
  0x10   :  { %378 = vmatmul.mubr.msk.f32.gmra.mrb[2].mxu0 %vm31_vm0, %v30_v13 }
  0x11   :  { %392 = vmatmul.mubr.msk.f32.gmra.mrb[2].mxu1 %vm31_vm0, %v132_v14 }
  0x81   :  { %v270_v23 = vpop.permute.xlu1 %269  ;;  %v265_v24 = vpop.permute.xlu0 %264 }
  0x82   :  { %v289_v32 = vmul.f32 %v348_v27, %v270_v23  ;;  %v288_v40 = vmul.f32 %v348_v27, %v265_v24 }
  0x86   :  { %v280_v25 = vpop.permute.xlu1 %279 }
  0x87   :  { %v275_v26 = vpop.permute.xlu0 %274  ;;  %v291_v47 = vmul.f32 %v348_v27, %v280_v25 }
  0x88   :  { %v290_v48 = vmul.f32 %v348_v27, %v275_v26 }
  0xdf   :  { %v376_v15 = vpop.f32.mrb[0].mxu0 }
  0xe0   :  { %v390_v16 = vpop.f32.mrb[0].mxu1  ;;  %238 = vperm.xlu0 %411, %v376_v15   ;;  %v110_v18 = vpop.f32.mrb[1].mxu0 }
  0xe1   :  { %304 = vperm.xlu1 %412, %v390_v16   ;;  %v211_v17 = vpop.f32.mrb[1].mxu1 }
  0xe3   :  { %v379_v19 = vpop.f32.mrb[2].mxu0 }
  0xe4   :  { %v393_v20 = vpop.f32.mrb[2].mxu1  ;;  %233 = vperm.xlu0 %411, %v110_v18   ;;  %v120_v21 = vpop.f32.mrb[3].mxu0 }
  0xe5   :  { %248 = vperm.xlu1 %412, %v379_v19   ;;  %v221_v22 = vpop.f32.mrb[3].mxu1 }
  0xe8   :  { %299 = vperm.xlu0 %411, %v211_v17  }
  0xe9   :  { %243 = vperm.xlu1 %412, %v120_v21  }
  0xec   :  { %309 = vperm.xlu0 %411, %v221_v22  }
  0xed   :  { %314 = vperm.xlu1 %412, %v393_v20  }
 0x15f   :  { %v239_v31 = vpop.permute.xlu0 %238 }
 0x160   :  { %v305_v30 = vpop.permute.xlu1 %304  ;;  %v258_v33 = vmul.f32 %v347_v28, %v239_v31 }
 0x161   :  { %v324_v34 = vmul.f32 %v349_v29, %v305_v30 }
 0x162   :  { %v293_v35 = vadd.f32 %v289_v32, %v258_v33 }
 0x163   :  { %v234_v36 = vpop.permute.xlu0 %233 }
 0x164   :  { %v249_v37 = vpop.permute.xlu1 %248  ;;  %v328_v38 = vadd.f32 %v324_v34, %v293_v35  ;;  %v257_v39 = vmul.f32 %v347_v28, %v234_v36 }
 0x165   :  { %v260_v44 = vmul.f32 %v347_v28, %v249_v37 }
 0x166   :  { %332 = vst.msk [vmem:[%s524_s6 + $0x8] sm:$0xff] %vm31_vm0, %v328_v38  ;;  %v292_v43 = vadd.f32 %v288_v40, %v257_v39 }
 0x167   :  { %v300_v41 = vpop.permute.xlu0 %299  ;;  %v295_v52 = vadd.f32 %v291_v47, %v260_v44 }
 0x168   :  { %v244_v42 = vpop.permute.xlu1 %243  ;;  %v323_v45 = vmul.f32 %v349_v29, %v300_v41 }
 0x169   :  { %v259_v46 = vmul.f32 %v347_v28, %v244_v42 }
 0x16a   :  { %v327_v49 = vadd.f32 %v323_v45, %v292_v43 }
 0x16b   :  { %v310_v50 = vpop.permute.xlu0 %309  ;;  %v294_v53 = vadd.f32 %v290_v48, %v259_v46 }
 0x16c   :  { %v315_v51 = vpop.permute.xlu1 %314  ;;  %331 = vst.msk [vmem:[%s524_s6] sm:$0xff] %vm31_vm0, %v327_v49  ;;  %v325_v54 = vmul.f32 %v349_v29, %v310_v50 }
 0x16d   :  { %v326_v55 = vmul.f32 %v349_v29, %v315_v51 }
 0x16e   :  { %v329_v56 = vadd.f32 %v325_v54, %v294_v53 }
 0x16f   :  { %v330_v57 = vadd.f32 %v326_v55, %v295_v52 }
 0x170   :  { %333 = vst.msk [vmem:[%s524_s6 + $0x10] sm:$0xff] %vm31_vm0, %v329_v56 }
 0x171   :  { %334 = vst.msk [vmem:[%s524_s6 + $0x18] sm:$0xff] %vm31_vm0, %v330_v57 }

// kernel: reverse.13
= control target key start
LH: loop header
LB: loop body
LE: loop exit
PB: predicated region body
PF: predicated region fallthrough
CT: control target
= control target key end

     0   :  { %v2_v0 = vlaneseq  ;;  %s238_s0 = inlined_call_operand.vmem [shape: f32[2,4,8,7], index: 0, kind: input, shape index: {}]   ;;  %s239_s1 = inlined_call_operand.vmem [shape: f32[2,4,8,7], index: 1, kind: output, shape index: {}]  }
   0x1   :  { %v50_v2 = vld [vmem:[%s238_s0 + $0x10] sm:$0xff]  ;;  %v46_v3 = vld [vmem:[%s238_s0] sm:$0xff]  ;;  %v52_v4 = vld [vmem:[%s238_s0 + $0x18] sm:$0xff] }
   0x2   :  { %v3_v1 = vsub.s32 6, %v2_v0  ;;  %v48_v5 = vld [vmem:[%s238_s0 + $0x8] sm:$0xff]  ;;  %v54_v7 = vld [vmem:[%s238_s0 + $0x20] sm:$0xff]  ;;  %v60_v8 = vld [vmem:[%s238_s0 + $0x38] sm:$0xff] }
   0x3   :  { %v56_v6 = vld [vmem:[%s238_s0 + $0x28] sm:$0xff]  ;;  %v58_v9 = vld [vmem:[%s238_s0 + $0x30] sm:$0xff] }
   0x4   :  { %4 = vset.pattern.permute.xlu0 %v3_v1  ;;  %179 = vset.pattern.permute.xlu1 %v3_v1 }
   0x5   :  { %78 = vperm.xlu1 %179, %v50_v2   ;;  %66 = vperm.xlu0 %4, %v46_v3  }
   0x9   :  { %84 = vperm.xlu1 %179, %v52_v4   ;;  %72 = vperm.xlu0 %4, %v48_v5  }
   0xd   :  { %96 = vperm.xlu1 %179, %v56_v6   ;;  %90 = vperm.xlu0 %4, %v54_v7  }
  0x11   :  { %108 = vperm.xlu1 %179, %v60_v8   ;;  %102 = vperm.xlu0 %4, %v58_v9  }
  0x84   :  { %v79_v10 = vpop.permute.xlu1 %78  ;;  %v67_v11 = vpop.permute.xlu0 %66 }
  0x85   :  { %157 = vst [vmem:[%s239_s1 + $0x10] sm:$0xff] %v79_v10  ;;  %153 = vst [vmem:[%s239_s1] sm:$0xff] %v67_v11 }
  0x88   :  { %v85_v12 = vpop.permute.xlu1 %84  ;;  %v73_v13 = vpop.permute.xlu0 %72 }
  0x89   :  { %159 = vst [vmem:[%s239_s1 + $0x18] sm:$0xff] %v85_v12  ;;  %155 = vst [vmem:[%s239_s1 + $0x8] sm:$0xff] %v73_v13 }
  0x8c   :  { %v97_v14 = vpop.permute.xlu1 %96  ;;  %v91_v15 = vpop.permute.xlu0 %90 }
  0x8d   :  { %163 = vst [vmem:[%s239_s1 + $0x28] sm:$0xff] %v97_v14  ;;  %161 = vst [vmem:[%s239_s1 + $0x20] sm:$0xff] %v91_v15 }
  0x90   :  { %v109_v16 = vpop.permute.xlu1 %108  ;;  %v103_v17 = vpop.permute.xlu0 %102 }
  0x91   :  { %167 = vst [vmem:[%s239_s1 + $0x38] sm:$0xff] %v109_v16  ;;  %165 = vst [vmem:[%s239_s1 + $0x30] sm:$0xff] %v103_v17 }

// kernel: _lambda_.20
= control target key start
LH: loop header
LB: loop body
LE: loop exit
PB: predicated region body
PF: predicated region fallthrough
CT: control target
= control target key end

     0   :  { %vm42_vm0 = vcmask 261120   ;;  %s1029_s3 = inlined_call_operand.vmem [shape: f32[32,32], index: 3, kind: input, shape index: {}]   ;;  %s1030_s1 = inlined_call_operand.vmem [shape: f32[32,32], index: 1, kind: input, shape index: {}]   ;;  %s1031_s0 = inlined_call_operand.vmem [shape: f32[32,32], index: 0, kind: input, shape index: {}]   ;;  %s1032_s2 = inlined_call_operand.vmem [shape: f32[32,32], index: 2, kind: input, shape index: {}]   ;;  %s1033_s4 = inlined_call_operand.vmem [shape: f32[1,32], index: 4, kind: input, shape index: {}]   ;;  %s1034_s5 = inlined_call_operand.vmem [shape: f32[32,128], index: 5, kind: input, shape index: {}]   ;;  %s1035_s6 = inlined_call_operand.vmem [shape: f32[128,32], index: 6, kind: input, shape index: {}]   ;;  %s1036_s7 = inlined_call_operand.vmem [shape: f32[32,32], index: 7, kind: output, shape index: {}]  }
   0x1   :  { %v38_v0 = vld [vmem:[%s1029_s3] sm:$0xff]  ;;  %v39_v1 = vld [vmem:[%s1029_s3 + $0x8] sm:$0xff]  ;;  %v40_v2 = vld [vmem:[%s1029_s3 + $0x10] sm:$0xff] }
   0x2   :  { %v742_v3 = vpack.c.bf16 %v39_v1, %v38_v0  ;;  %v41_v4 = vld [vmem:[%s1029_s3 + $0x18] sm:$0xff]  ;;  %v34_v5 = vld [vmem:[%s1030_s1] sm:$0xff]  ;;  %v35_v7 = vld [vmem:[%s1030_s1 + $0x8] sm:$0xff] }
   0x3   :  { %v746_v6 = vpack.c.bf16 %v41_v4, %v40_v2  ;;  %656 = vmatprep.mubr.msk.f32.mxu0 %vm42_vm0, %v34_v5  ;;  %v36_v8 = vld [vmem:[%s1030_s1 + $0x10] sm:$0xff]  ;;  %v37_v9 = vld [vmem:[%s1030_s1 + $0x18] sm:$0xff]  ;;  %v885_v10 = vld [vmem:[%s1031_s0] sm:$0xff] }
   0x4   :  { %743 = vmatprep.subr.bf16.mxu0 %v742_v3  ;;  %v31_v11 = vld [vmem:[%s1032_s2 + $0x8] sm:$0xff]  ;;  %v30_v12 = vld [vmem:[%s1032_s2] sm:$0xff]  ;;  %v33_v18 = vld [vmem:[%s1032_s2 + $0x18] sm:$0xff] }
   0x5   :  { %745 = vmatpush3.bf16.msra.mxu0 %v742_v3  ;;  %v583_v14 = vld [vmem:[%s1033_s4] ss:$0 sm:$0xff]  ;;  %v32_v20 = vld [vmem:[%s1032_s2 + $0x10] sm:$0xff]  ;;  %v257_v29 = vld [vmem:[%s1034_s5 + $0x8] sm:$0xff] }
   0x6   :  { %747 = vmatprep.subr.bf16.mxu0 %v746_v6  ;;  %v256_v28 = vld [vmem:[%s1034_s5] sm:$0xff]  ;;  %v913_v33 = vld [vmem:[%s1031_s0 + $0x8] sm:$0xff]  ;;  %v918_v34 = vld [vmem:[%s1031_s0 + $0x10] sm:$0xff] }
   0x7   :  { %v758_v32 = vpack.c.bf16 %v257_v29, %v256_v28  ;;  %v927_v35 = vld [vmem:[%s1031_s0 + $0x18] sm:$0xff]  ;;  %v258_v36 = vld [vmem:[%s1034_s5 + $0x10] sm:$0xff]  ;;  %v377_v39 = vld [vmem:[%s1035_s6] sm:$0xff] }
   0x8   :  { %v259_v37 = vld [vmem:[%s1034_s5 + $0x18] sm:$0xff]  ;;  %v378_v40 = vld [vmem:[%s1035_s6 + $0x8] sm:$0xff]  ;;  %v379_v41 = vld [vmem:[%s1035_s6 + $0x10] sm:$0xff] }
   0x9   :  { %749 = vmatpush3.bf16.msra.mxu0 %v746_v6  ;;  %v762_v38 = vpack.c.bf16 %v259_v37, %v258_v36  ;;  %v766_v42 = vpack.c.bf16 %v378_v40, %v377_v39  ;;  %v380_v43 = vld [vmem:[%s1035_s6 + $0x18] sm:$0xff]  ;;  %v381_v45 = vld [vmem:[%s1035_s6 + $0x20] sm:$0xff]  ;;  %v382_v46 = vld [vmem:[%s1035_s6 + $0x28] sm:$0xff] }
   0xa   :  { %v770_v44 = vpack.c.bf16 %v380_v43, %v379_v41  ;;  %v774_v47 = vpack.c.bf16 %v382_v46, %v381_v45  ;;  %v383_v56 = vld [vmem:[%s1035_s6 + $0x30] sm:$0xff]  ;;  %v384_v57 = vld [vmem:[%s1035_s6 + $0x38] sm:$0xff]  ;;  %v385_v59 = vld [vmem:[%s1035_s6 + $0x40] sm:$0xff] }
   0xb   :  { %767 = vmatprep.subr.bf16.mxu1 %v766_v42  ;;  %v778_v58 = vpack.c.bf16 %v384_v57, %v383_v56  ;;  %v386_v60 = vld [vmem:[%s1035_s6 + $0x48] sm:$0xff]  ;;  %v387_v62 = vld [vmem:[%s1035_s6 + $0x50] sm:$0xff]  ;;  %v388_v63 = vld [vmem:[%s1035_s6 + $0x58] sm:$0xff] }
   0xc   :  { %657 = vmatmul.mubr.msk.f32.vlgmr.msra.gmra.mrb[0].mxu0 %vm42_vm0, %v35_v7  ;;  %769 = vmatpush3.bf16.msra.mxu1 %v766_v42  ;;  %v782_v61 = vpack.c.bf16 %v386_v60, %v385_v59  ;;  %v786_v0 = vpack.c.bf16 %v388_v63, %v387_v62  ;;  %v389_v1 = vld [vmem:[%s1035_s6 + $0x60] sm:$0xff]  ;;  %v390_v2 = vld [vmem:[%s1035_s6 + $0x68] sm:$0xff]  ;;  %v391_v4 = vld [vmem:[%s1035_s6 + $0x70] sm:$0xff] }
   0xd   :  { %659 = vmatprep.mubr.msk.f32.mxu0 %vm42_vm0, %v36_v8  ;;  %771 = vmatprep.subr.bf16.mxu1 %v770_v44  ;;  %v790_v3 = vpack.c.bf16 %v390_v2, %v389_v1  ;;  %v392_v5 = vld [vmem:[%s1035_s6 + $0x78] sm:$0xff] }
   0xe   :  { %v794_v6 = vpack.c.bf16 %v392_v5, %v391_v4 }
  0x10   :  { %660 = vmatmul.mubr.msk.f32.gmra.mrb[2].mxu0 %vm42_vm0, %v37_v9  ;;  %773 = vmatpush3.bf16.msra.mxu1 %v770_v44 }
  0x11   :  { %670 = vmatprep.mubr.msk.f32.mxu0 %vm42_vm0, %v885_v10  ;;  %775 = vmatprep.subr.bf16.mxu1 %v774_v47 }
  0x14   :  { %777 = vmatpush3.bf16.msra.mxu1 %v774_v47 }
  0x15   :  { %779 = vmatprep.subr.bf16.mxu1 %v778_v58 }
  0x18   :  { %781 = vmatpush3.bf16.msra.mxu1 %v778_v58 }
  0x19   :  { %783 = vmatprep.subr.bf16.mxu1 %v782_v61 }
  0x1c   :  { %785 = vmatpush3.bf16.msra.mxu1 %v782_v61 }
  0x1d   :  { %787 = vmatprep.subr.bf16.mxu1 %v786_v0 }
  0x20   :  { %789 = vmatpush3.bf16.msra.mxu1 %v786_v0 }
  0x21   :  { %791 = vmatprep.subr.bf16.mxu1 %v790_v3 }
  0x24   :  { %793 = vmatpush3.bf16.msra.mxu1 %v790_v3 }
  0x25   :  { %795 = vmatprep.subr.bf16.mxu1 %v794_v6 }
  0x28   :  { %797 = vmatpush3.bf16.msra.mxu1 %v794_v6 }
  0xdf   :  { %v658_v13 = vpop.f32.mrb[0].mxu0 }
  0xe0   :  { %v141_v15 = vadd.f32 %v658_v13, %v31_v11  ;;  %v121_v16 = vpop.f32.mrb[1].mxu0 }
  0xe1   :  { %v140_v17 = vadd.f32 %v121_v16, %v30_v12 }
  0xe2   :  { %v152_v19 = vadd.f32 %v583_v14, %v141_v15 }
  0xe3   :  { %v151_v21 = vadd.f32 %v583_v14, %v140_v17  ;;  %v661_v22 = vpop.f32.mrb[2].mxu0 }
  0xe4   :  { %v143_v23 = vadd.f32 %v661_v22, %v33_v18  ;;  %v131_v24 = vpop.f32.mrb[3].mxu0 }
  0xe5   :  { %v142_v25 = vadd.f32 %v131_v24, %v32_v20  ;;  %v750_v26 = vpack.c.bf16 %v152_v19, %v151_v21 }
  0xe6   :  { %v154_v27 = vadd.f32 %v583_v14, %v143_v23 }
  0xe7   :  { %v153_v30 = vadd.f32 %v583_v14, %v142_v25  ;;  %751 = vmatprep.subr.bf16.mxu0 %v750_v26 }
  0xe8   :  { %753 = vmatpush3.bf16.msra.mxu0 %v750_v26 }
  0xe9   :  { %v754_v31 = vpack.c.bf16 %v154_v27, %v153_v30 }
  0xeb   :  { %755 = vmatprep.subr.bf16.mxu0 %v754_v31 }
  0xec   :  { %757 = vmatpush3.bf16.msra.mxu0 %v754_v31 }
  0xed   :  { %759 = vmatprep.subr.bf16.mxu0 %v758_v32 }
  0xef   :  { %671 = vmatmul.mubr.msk.f32.vlgmr.msra.gmra.mrb[4].mxu0 %vm42_vm0, %v913_v33 }
  0xf0   :  { %673 = vmatprep.mubr.msk.f32.mxu0 %vm42_vm0, %v918_v34  ;;  %761 = vmatpush3.bf16.msra.mxu0 %v758_v32 }
  0xf1   :  { %763 = vmatprep.subr.bf16.mxu0 %v762_v38 }
  0xf3   :  { %674 = vmatmul.mubr.msk.f32.gmra.mrb[6].mxu0 %vm42_vm0, %v927_v35 }
  0xf4   :  { %765 = vmatpush3.bf16.msra.mxu0 %v762_v38 }
 0x1c2   :  { %v672_v48 = vpop.f32.mrb[4].mxu0 }
 0x1c3   :  { %v233_v49 = vpop.f32.mrb[5].mxu0  ;;  %v957_v51 = vsub.f32 %v152_v19, %v672_v48 }
 0x1c4   :  { %v955_v50 = vsub.f32 %v151_v21, %v233_v49 }
 0x1c6   :  { %v675_v52 = vpop.f32.mrb[6].mxu0  ;;  %684 = vmatprep.mubr.msk.f32.mxu0 %vm42_vm0, %v955_v50 }
 0x1c7   :  { %v243_v53 = vpop.f32.mrb[7].mxu0  ;;  %685 = vmatmul.mubr.msk.f32.vlgmr.msra.gmra.mrb[8].mxu0 %vm42_vm0, %v957_v51  ;;  %v965_v55 = vsub.f32 %v154_v27, %v675_v52 }
 0x1c8   :  { %v963_v54 = vsub.f32 %v153_v30, %v243_v53 }
 0x1ca   :  { %687 = vmatprep.mubr.msk.f32.mxu0 %vm42_vm0, %v963_v54 }
 0x1cb   :  { %688 = vmatmul.mubr.msk.f32.gmra.mrb[10].mxu0 %vm42_vm0, %v965_v55 }
 0x1cc   :  { %736 = vmatprep.mubr.msk.f32.mxu0 %vm42_vm0, %v885_v10 }
 0x29a   :  { %v686_v7 = vpop.f32.mrb[8].mxu0 }
 0x29b   :  { %v362_v8 = vmul.f32 0.70710677, %v686_v7  ;;  %v338_v9 = vpop.f32.mrb[9].mxu0  ;;  %v358_v20 = vmul.f32 0.5, %v686_v7 }
 0x29c   :  { %v361_v10 = vmul.f32 0.70710677, %v338_v9  ;;  %v357_v18 = vmul.f32 0.5, %v338_v9 }
 0x29d   :  { %806 = verf.f32 %v362_v8 }
 0x29e   :  { %808 = verf.f32 %v361_v10  ;;  %v689_v11 = vpop.f32.mrb[10].mxu0 }
 0x29f   :  { %v364_v12 = vmul.f32 0.70710677, %v689_v11  ;;  %v348_v13 = vpop.f32.mrb[11].mxu0  ;;  %v360_v28 = vmul.f32 0.5, %v689_v11 }
 0x2a0   :  { %v363_v14 = vmul.f32 0.70710677, %v348_v13  ;;  %v359_v26 = vmul.f32 0.5, %v348_v13 }
 0x2a1   :  { %810 = verf.f32 %v364_v12 }
 0x2a2   :  { %812 = verf.f32 %v363_v14 }
 0x2a7   :  { %v807_v15 = vpop.eup %806 }
 0x2a8   :  { %v809_v16 = vpop.eup %808  ;;  %v370_v17 = vadd.f32 1.0, %v807_v15 }
 0x2a9   :  { %v369_v19 = vadd.f32 1.0, %v809_v16 }
 0x2aa   :  { %v374_v24 = vmul.f32 %v370_v17, %v358_v20 }
 0x2ab   :  { %v811_v21 = vpop.eup %810  ;;  %v373_v22 = vmul.f32 %v369_v19, %v357_v18 }
 0x2ac   :  { %v813_v23 = vpop.eup %812  ;;  %v372_v25 = vadd.f32 1.0, %v811_v21 }
 0x2ad   :  { %v371_v27 = vadd.f32 1.0, %v813_v23  ;;  %722 = vmatprep.mubr.f32.mxu1 %v373_v22 }
 0x2ae   :  { %723 = vmatmul.mubr.f32.vlgmr.msra.gmra.mrb[0].mxu1 %v374_v24  ;;  %v376_v30 = vmul.f32 %v372_v25, %v360_v28 }
 0x2af   :  { %v375_v29 = vmul.f32 %v371_v27, %v359_v26 }
 0x2b1   :  { %725 = vmatprep.mubr.f32.mxu1 %v375_v29 }
 0x2b2   :  { %726 = vmatmul.mubr.f32.gmra.mrb[2].mxu1 %v376_v30 }
 0x381   :  { %v724_v31 = vpop.f32.mrb[0].mxu1 }
 0x382   :  { %v479_v32 = vadd.f32 %v724_v31, %v957_v51  ;;  %v459_v36 = vpop.f32.mrb[1].mxu1 }
 0x383   :  { %v478_v37 = vadd.f32 %v459_v36, %v955_v50 }
 0x385   :  { %v798_v38 = vpack.c.bf16 %v479_v32, %v478_v37  ;;  %v727_v39 = vpop.f32.mrb[2].mxu1 }
 0x386   :  { %v481_v40 = vadd.f32 %v727_v39, %v965_v55  ;;  %v469_v41 = vpop.f32.mrb[3].mxu1 }
 0x387   :  { %v480_v42 = vadd.f32 %v469_v41, %v963_v54  ;;  %799 = vmatprep.subr.bf16.mxu0 %v798_v38 }
 0x388   :  { %801 = vmatpush3.bf16.msra.mxu0 %v798_v38 }
 0x389   :  { %v802_v43 = vpack.c.bf16 %v481_v40, %v480_v42 }
 0x38b   :  { %803 = vmatprep.subr.bf16.mxu0 %v802_v43 }
 0x38c   :  { %805 = vmatpush3.bf16.msra.mxu0 %v802_v43 }
 0x38f   :  { %737 = vmatmul.mubr.msk.f32.vlgmr.msra.gmra.mrb[12].mxu0 %vm42_vm0, %v913_v33 }
 0x390   :  { %739 = vmatprep.mubr.msk.f32.mxu0 %vm42_vm0, %v918_v34 }
 0x393   :  { %740 = vmatmul.mubr.msk.f32.gmra.mrb[14].mxu0 %vm42_vm0, %v927_v35 }
 0x462   :  { %v738_v44 = vpop.f32.mrb[12].mxu0 }
 0x463   :  { %v568_v45 = vsub.f32 %v479_v32, %v738_v44  ;;  %v548_v46 = vpop.f32.mrb[13].mxu0 }
 0x464   :  { %v567_v47 = vsub.f32 %v478_v37, %v548_v46 }
 0x465   :  { %572 = vst.msk [vmem:[%s1036_s7 + $0x8] sm:$0xff] %vm42_vm0, %v568_v45 }
 0x466   :  { %571 = vst.msk [vmem:[%s1036_s7] sm:$0xff] %vm42_vm0, %v567_v47  ;;  %v741_v33 = vpop.f32.mrb[14].mxu0 }
 0x467   :  { %v570_v48 = vsub.f32 %v481_v40, %v741_v33  ;;  %v558_v34 = vpop.f32.mrb[15].mxu0 }
 0x468   :  { %v569_v49 = vsub.f32 %v480_v42, %v558_v34 }
 0x469   :  { %574 = vst.msk [vmem:[%s1036_s7 + $0x18] sm:$0xff] %vm42_vm0, %v570_v48 }
 0x46a   :  { %573 = vst.msk [vmem:[%s1036_s7 + $0x10] sm:$0xff] %vm42_vm0, %v569_v49 }

// kernel: _lambda_.23
= control target key start
LH: loop header
LB: loop body
LE: loop exit
PB: predicated region body
PF: predicated region fallthrough
CT: control target
= control target key end

     0   :  { %vm21_vm0 = vcmask 261120   ;;  %s341_s1 = inlined_call_operand.vmem [shape: f32[32,32], index: 1, kind: input, shape index: {}]   ;;  %s342_s0 = inlined_call_operand.vmem [shape: f32[32,32], index: 0, kind: input, shape index: {}]   ;;  %s343_s2 = inlined_call_operand.vmem [shape: f32[1,32], index: 2, kind: input, shape index: {}]   ;;  %s344_s3 = inlined_call_operand.vmem [shape: f32[1,32], index: 3, kind: input, shape index: {}]   ;;  %s345_s4 = inlined_call_operand.vmem [shape: f32[32,32], index: 4, kind: output, shape index: {}]  }
   0x1   :  { %v17_v0 = vld [vmem:[%s341_s1] sm:$0xff]  ;;  %v19_v1 = vld [vmem:[%s341_s1 + $0x10] sm:$0xff]  ;;  %v18_v2 = vld [vmem:[%s341_s1 + $0x8] sm:$0xff] }
   0x2   :  { %v22_v3 = vsel %vm21_vm0, %v17_v0, 0.0  ;;  %v28_v4 = vsel %vm21_vm0, %v19_v1, 0.0  ;;  %v20_v5 = vld [vmem:[%s341_s1 + $0x18] sm:$0xff]  ;;  %v25_v6 = vsel %vm21_vm0, %v18_v2, 0.0  ;;  %v97_v28 = vld [vmem:[%s342_s0] sm:$0xff]  ;;  %v99_v29 = vld [vmem:[%s342_s0 + $0x10] sm:$0xff] }
   0x3   :  { %23 = vadd.xlane.f32.xlu0 %v22_v3  ;;  %29 = vadd.xlane.f32.xlu1 %v28_v4  ;;  %v31_v7 = vsel %vm21_vm0, %v20_v5, 0.0  ;;  %v210_v44 = vld [vmem:[%s343_s2] ss:$0 sm:$0xff]  ;;  %v98_v62 = vld [vmem:[%s342_s0 + $0x8] sm:$0xff]  ;;  %v100_v63 = vld [vmem:[%s342_s0 + $0x18] sm:$0xff] }
   0x4   :  { %232 = vmatprep.mubr.msk.f32.mxu0 %vm21_vm0, %v97_v28  ;;  %235 = vmatprep.mubr.msk.f32.mxu1 %vm21_vm0, %v99_v29  ;;  %v211_v50 = vld [vmem:[%s344_s3] ss:$0 sm:$0xff] }
   0x7   :  { %26 = vadd.xlane.f32.xlu0 %v25_v6  ;;  %32 = vadd.xlane.f32.xlu1 %v31_v7 }
  0x90   :  { %v24_v8 = vpop.xlane.xlu0 %23  ;;  %v30_v9 = vpop.xlane.xlu1 %29 }
  0x91   :  { %v35_v10 = vmul.f32 0.03125, %v24_v8  ;;  %v37_v11 = vmul.f32 0.03125, %v30_v9 }
  0x93   :  { %v39_v12 = vsub.f32 %v17_v0, %v35_v10  ;;  %v41_v13 = vsub.f32 %v19_v1, %v37_v11 }
  0x94   :  { %v27_v14 = vpop.xlane.xlu0 %26  ;;  %v33_v15 = vpop.xlane.xlu1 %32 }
  0x95   :  { %v36_v16 = vmul.f32 0.03125, %v27_v14  ;;  %v38_v17 = vmul.f32 0.03125, %v33_v15  ;;  %v43_v18 = vmul.f32 %v39_v12, %v39_v12  ;;  %v45_v19 = vmul.f32 %v41_v13, %v41_v13 }
  0x97   :  { %v40_v20 = vsub.f32 %v18_v2, %v36_v16  ;;  %v42_v21 = vsub.f32 %v20_v5, %v38_v17  ;;  %v47_v22 = vsel %vm21_vm0, %v43_v18, 0.0  ;;  %v53_v23 = vsel %vm21_vm0, %v45_v19, 0.0 }
  0x98   :  { %48 = vadd.xlane.f32.xlu0 %v47_v22 }
  0x99   :  { %v44_v24 = vmul.f32 %v40_v20, %v40_v20  ;;  %v46_v25 = vmul.f32 %v42_v21, %v42_v21 }
  0x9b   :  { %v50_v26 = vsel %vm21_vm0, %v44_v24, 0.0  ;;  %v56_v27 = vsel %vm21_vm0, %v46_v25, 0.0 }
  0x9c   :  { %54 = vadd.xlane.f32.xlu0 %v53_v23  ;;  %51 = vadd.xlane.f32.xlu1 %v50_v26 }
  0xa0   :  { %57 = vadd.xlane.f32.xlu1 %v56_v27 }
 0x125   :  { %v49_v30 = vpop.xlane.xlu0 %48 }
 0x126   :  { %v59_v31 = vmul.f32 0.03125, %v49_v30 }
 0x128   :  { %v63_v32 = vadd.f32 1e-05, %v59_v31 }
 0x129   :  { %v52_v33 = vpop.xlane.xlu1 %51  ;;  %v55_v34 = vpop.xlane.xlu0 %54 }
 0x12a   :  { %250 = vrsqrt.f32 %v63_v32  ;;  %v60_v35 = vmul.f32 0.03125, %v52_v33  ;;  %v61_v36 = vmul.f32 0.03125, %v55_v34 }
 0x12c   :  { %v64_v37 = vadd.f32 1e-05, %v60_v35  ;;  %v65_v38 = vadd.f32 1e-05, %v61_v36 }
 0x12d   :  { %v58_v39 = vpop.xlane.xlu1 %57 }
 0x12e   :  { %252 = vrsqrt.f32 %v64_v37  ;;  %v62_v40 = vmul.f32 0.03125, %v58_v39 }
 0x12f   :  { %254 = vrsqrt.f32 %v65_v38 }
 0x130   :  { %v66_v41 = vadd.f32 1e-05, %v62_v40 }
 0x132   :  { %256 = vrsqrt.f32 %v66_v41 }
 0x134   :  { %v251_v42 = vpop.eup %250 }
 0x135   :  { %v71_v43 = vmul.f32 %v251_v42, %v39_v12 }
 0x137   :  { %v82_v48 = vmul.f32 %v210_v44, %v71_v43 }
 0x138   :  { %v253_v45 = vpop.eup %252 }
 0x139   :  { %v255_v46 = vpop.eup %254  ;;  %v72_v47 = vmul.f32 %v253_v45, %v40_v20  ;;  %v93_v54 = vadd.f32 %v211_v50, %v82_v48 }
 0x13a   :  { %v73_v49 = vmul.f32 %v255_v46, %v41_v13 }
 0x13b   :  { %v83_v51 = vmul.f32 %v210_v44, %v72_v47 }
 0x13c   :  { %v257_v52 = vpop.eup %256  ;;  %v84_v56 = vmul.f32 %v210_v44, %v73_v49 }
 0x13d   :  { %v74_v53 = vmul.f32 %v257_v52, %v42_v21  ;;  %v94_v55 = vadd.f32 %v211_v50, %v83_v51 }
 0x13e   :  { %v95_v59 = vadd.f32 %v211_v50, %v84_v56 }
 0x13f   :  { %v238_v57 = vpack.c.bf16 %v94_v55, %v93_v54  ;;  %v85_v58 = vmul.f32 %v210_v44, %v74_v53 }
 0x141   :  { %239 = vmatprep.subr.bf16.mxu0 %v238_v57  ;;  %246 = vmatprep.subr.bf16.mxu1 %v238_v57  ;;  %v96_v60 = vadd.f32 %v211_v50, %v85_v58 }
 0x142   :  { %241 = vmatpush3.bf16.msra.mxu0 %v238_v57  ;;  %248 = vmatpush3.bf16.msra.mxu1 %v238_v57 }
 0x143   :  { %v242_v61 = vpack.c.bf16 %v96_v60, %v95_v59 }
 0x145   :  { %243 = vmatprep.subr.bf16.mxu0 %v242_v61  ;;  %247 = vmatprep.subr.bf16.mxu1 %v242_v61 }
 0x146   :  { %245 = vmatpush3.bf16.msra.mxu0 %v242_v61  ;;  %249 = vmatpush3.bf16.msra.mxu1 %v242_v61 }
 0x149   :  { %233 = vmatmul.mubr.msk.f32.vlgmr.msra.gmra.mrb[0].mxu0 %vm21_vm0, %v98_v62  ;;  %236 = vmatmul.mubr.msk.f32.vlgmr.msra.gmra.mrb[0].mxu1 %vm21_vm0, %v100_v63 }
 0x21c   :  { %v234_v0 = vpop.f32.mrb[0].mxu0  ;;  %v237_v1 = vpop.f32.mrb[0].mxu1 }
 0x21d   :  { %v199_v2 = vsub.f32 %v94_v55, %v234_v0  ;;  %v201_v3 = vsub.f32 %v96_v60, %v237_v1  ;;  %v179_v4 = vpop.f32.mrb[1].mxu0  ;;  %v189_v5 = vpop.f32.mrb[1].mxu1 }
 0x21e   :  { %v198_v6 = vsub.f32 %v93_v54, %v179_v4  ;;  %v200_v7 = vsub.f32 %v95_v59, %v189_v5 }
 0x21f   :  { %203 = vst.msk [vmem:[%s345_s4 + $0x8] sm:$0xff] %vm21_vm0, %v199_v2  ;;  %205 = vst.msk [vmem:[%s345_s4 + $0x18] sm:$0xff] %vm21_vm0, %v201_v3 }
 0x220   :  { %202 = vst.msk [vmem:[%s345_s4] sm:$0xff] %vm21_vm0, %v198_v6  ;;  %204 = vst.msk [vmem:[%s345_s4 + $0x10] sm:$0xff] %vm21_vm0, %v200_v7 }

// kernel: _lambda_.24
= control target key start
LH: loop header
LB: loop body
LE: loop exit
PB: predicated region body
PF: predicated region fallthrough
CT: control target
= control target key end

     0   :  { %vm51_vm0 = vcmask 261120   ;;  %vm501_vm1 = vcmask 523264   ;;  %s900_s4 = inlined_call_operand.vmem [shape: f32[32,32], index: 4, kind: input, shape index: {}]   ;;  %s901_s1 = inlined_call_operand.vmem [shape: f32[32,32], index: 1, kind: input, shape index: {}]   ;;  %s902_s0 = inlined_call_operand.vmem [shape: f32[32,32], index: 0, kind: input, shape index: {}]   ;;  %s903_s6 = inlined_call_operand.vmem [shape: f32[32,32], index: 6, kind: input, shape index: {}]   ;;  %s904_s2 = inlined_call_operand.vmem [shape: f32[32,32], index: 2, kind: input, shape index: {}]   ;;  %s905_s5 = inlined_call_operand.vmem [shape: f32[1,32], index: 5, kind: input, shape index: {}]   ;;  %s906_s8 = inlined_call_operand.vmem [shape: f32[32,64], index: 8, kind: input, shape index: {}]   ;;  %s907_s3 = inlined_call_operand.vmem [shape: f32[32,32], index: 3, kind: input, shape index: {}]   ;;  %s908_s11 = inlined_call_operand.vmem [shape: f32[32,32], index: 11, kind: output, shape index: {1}]   ;;  %s909_s10 = inlined_call_operand.vmem [shape: f32[32,32], index: 10, kind: output, shape index: {0}]   ;;  %s910_s9 = inlined_call_operand.vmem [shape: f32[1,64], index: 9, kind: input, shape index: {}]   ;;  %s911_s13 = inlined_call_operand.vmem [shape: f32[32,64], index: 13, kind: output, shape index: {3}]   ;;  %s912_s7 = inlined_call_operand.vmem [shape: f32[1,32], index: 7, kind: input, shape index: {}]   ;;  %s913_s12 = inlined_call_operand.vmem [shape: f32[32,32], index: 12, kind: output, shape index: {2}]  }
   0x1   :  { %v47_v0 = vld [vmem:[%s900_s4] sm:$0xff]  ;;  %v48_v1 = vld [vmem:[%s900_s4 + $0x8] sm:$0xff]  ;;  %v49_v2 = vld [vmem:[%s900_s4 + $0x10] sm:$0xff] }
   0x2   :  { %v629_v3 = vpack.c.bf16 %v48_v1, %v47_v0  ;;  %v50_v4 = vld [vmem:[%s900_s4 + $0x18] sm:$0xff]  ;;  %v43_v5 = vld [vmem:[%s901_s1] sm:$0xff]  ;;  %v44_v7 = vld [vmem:[%s901_s1 + $0x8] sm:$0xff] }
   0x3   :  { %v633_v6 = vpack.c.bf16 %v50_v4, %v49_v2  ;;  %581 = vmatprep.mubr.msk.f32.mxu0 %vm51_vm0, %v43_v5  ;;  %v45_v8 = vld [vmem:[%s901_s1 + $0x10] sm:$0xff]  ;;  %v46_v9 = vld [vmem:[%s901_s1 + $0x18] sm:$0xff]  ;;  %v164_v10 = vld [vmem:[%s902_s0] sm:$0xff] }
   0x4   :  { %630 = vmatprep.subr.bf16.mxu0 %v629_v3  ;;  %595 = vmatprep.mubr.msk.f32.mxu1 %vm51_vm0, %v164_v10  ;;  %v277_v11 = vld [vmem:[%s903_s6] sm:$0xff]  ;;  %v278_v12 = vld [vmem:[%s903_s6 + $0x8] sm:$0xff]  ;;  %v42_v21 = vld [vmem:[%s904_s2 + $0x18] sm:$0xff] }
   0x5   :  { %632 = vmatpush3.bf16.msra.mxu0 %v629_v3  ;;  %v645_v13 = vpack.c.bf16 %v278_v12, %v277_v11  ;;  %v40_v14 = vld [vmem:[%s904_s2 + $0x8] sm:$0xff]  ;;  %v39_v15 = vld [vmem:[%s904_s2] sm:$0xff]  ;;  %v41_v23 = vld [vmem:[%s904_s2 + $0x10] sm:$0xff] }
   0x6   :  { %634 = vmatprep.subr.bf16.mxu0 %v633_v6  ;;  %v526_v17 = vld [vmem:[%s905_s5] ss:$0 sm:$0xff]  ;;  %v394_v32 = vld [vmem:[%s906_s8 + $0x8] sm:$0xff]  ;;  %v166_v37 = vld [vmem:[%s902_s0 + $0x10] sm:$0xff] }
   0x7   :  { %v393_v31 = vld [vmem:[%s906_s8] sm:$0xff]  ;;  %v165_v36 = vld [vmem:[%s902_s0 + $0x8] sm:$0xff]  ;;  %v167_v38 = vld [vmem:[%s902_s0 + $0x18] sm:$0xff] }
   0x8   :  { %v653_v35 = vpack.c.bf16 %v394_v32, %v393_v31  ;;  %v395_v39 = vld [vmem:[%s906_s8 + $0x10] sm:$0xff]  ;;  %v396_v40 = vld [vmem:[%s906_s8 + $0x18] sm:$0xff]  ;;  %v389_v45 = vld [vmem:[%s907_s3] sm:$0xff] }
   0x9   :  { %636 = vmatpush3.bf16.msra.mxu0 %v633_v6  ;;  %v279_v41 = vld [vmem:[%s903_s6 + $0x10] sm:$0xff]  ;;  %v280_v42 = vld [vmem:[%s903_s6 + $0x18] sm:$0xff]  ;;  %v657_v43 = vpack.c.bf16 %v396_v40, %v395_v39  ;;  %v390_v46 = vld [vmem:[%s907_s3 + $0x8] sm:$0xff] }
   0xa   :  { %646 = vmatprep.subr.bf16.mxu0 %v645_v13  ;;  %v649_v44 = vpack.c.bf16 %v280_v42, %v279_v41  ;;  %v391_v47 = vld [vmem:[%s907_s3 + $0x10] sm:$0xff]  ;;  %v392_v48 = vld [vmem:[%s907_s3 + $0x18] sm:$0xff]  ;;  %v536_v57 = vld [vmem:[%s910_s9] ss:$0 sm:$0xff] }
   0xb   :  { %v531_v2 = vld [vmem:[%s912_s7] ss:$0 sm:$0xff] }
   0xc   :  { %582 = vmatmul.mubr.msk.f32.vlgmr.msra.gmra.mrb[0].mxu0 %vm51_vm0, %v44_v7 }
   0xd   :  { %584 = vmatprep.mubr.msk.f32.mxu0 %vm51_vm0, %v45_v8  ;;  %648 = vmatpush3.bf16.msra.mxu0 %v645_v13 }
   0xe   :  { %650 = vmatprep.subr.bf16.mxu0 %v649_v44 }
  0x10   :  { %585 = vmatmul.mubr.msk.f32.gmra.mrb[2].mxu0 %vm51_vm0, %v46_v9 }
  0x11   :  { %652 = vmatpush3.bf16.msra.mxu0 %v649_v44 }
  0xdf   :  { %v583_v16 = vpop.f32.mrb[0].mxu0 }
  0xe0   :  { %v150_v18 = vadd.f32 %v583_v16, %v40_v14  ;;  %v130_v19 = vpop.f32.mrb[1].mxu0 }
  0xe1   :  { %v149_v20 = vadd.f32 %v130_v19, %v39_v15 }
  0xe2   :  { %v161_v22 = vadd.f32 %v526_v17, %v150_v18 }
  0xe3   :  { %v160_v24 = vadd.f32 %v526_v17, %v149_v20  ;;  %v586_v25 = vpop.f32.mrb[2].mxu0 }
  0xe4   :  { %v152_v26 = vadd.f32 %v586_v25, %v42_v21  ;;  %v140_v27 = vpop.f32.mrb[3].mxu0 }
  0xe5   :  { %v151_v28 = vadd.f32 %v140_v27, %v41_v23  ;;  %v637_v29 = vpack.c.bf16 %v161_v22, %v160_v24 }
  0xe6   :  { %v163_v30 = vadd.f32 %v526_v17, %v152_v26 }
  0xe7   :  { %v162_v33 = vadd.f32 %v526_v17, %v151_v28  ;;  %638 = vmatprep.subr.bf16.mxu1 %v637_v29 }
  0xe8   :  { %640 = vmatpush3.bf16.msra.mxu1 %v637_v29 }
  0xe9   :  { %v641_v34 = vpack.c.bf16 %v163_v30, %v162_v33 }
  0xeb   :  { %642 = vmatprep.subr.bf16.mxu1 %v641_v34 }
  0xec   :  { %644 = vmatpush3.bf16.msra.mxu1 %v641_v34 }
  0xed   :  { %654 = vmatprep.subr.bf16.mxu1 %v653_v35 }
  0xef   :  { %596 = vmatmul.mubr.msk.f32.vlgmr.msra.gmra.mrb[0].mxu1 %vm51_vm0, %v165_v36 }
  0xf0   :  { %598 = vmatprep.mubr.msk.f32.mxu1 %vm51_vm0, %v166_v37  ;;  %656 = vmatpush3.bf16.msra.mxu1 %v653_v35 }
  0xf1   :  { %658 = vmatprep.subr.bf16.mxu1 %v657_v43 }
  0xf3   :  { %599 = vmatmul.mubr.msk.f32.gmra.mrb[2].mxu1 %vm51_vm0, %v167_v38 }
  0xf4   :  { %660 = vmatpush3.bf16.msra.mxu1 %v657_v43  ;;  %623 = vmatprep.mubr.msk.f32.mxu1 %vm51_vm0, %v389_v45 }
  0xf7   :  { %624 = vmatmul.mubr.msk.f32.vlgmr.msra.gmra.mrb[4].mxu1 %vm51_vm0, %v390_v46 }
  0xf8   :  { %626 = vmatprep.mubr.msk.f32.mxu1 %vm51_vm0, %v391_v47 }
  0xfb   :  { %627 = vmatmul.mubr.msk.f32.gmra.mrb[6].mxu1 %vm51_vm0, %v392_v48 }
 0x1c2   :  { %v597_v49 = vpop.f32.mrb[0].mxu1 }
 0x1c3   :  { %v266_v50 = vsub.f32 %v161_v22, %v597_v49  ;;  %274 = vst.msk [vmem:[%s908_s11 + $0x8] sm:$0xff] %vm51_vm0, %v597_v49  ;;  %v246_v51 = vpop.f32.mrb[1].mxu1 }
 0x1c4   :  { %v265_v52 = vsub.f32 %v160_v24, %v246_v51  ;;  %273 = vst.msk [vmem:[%s908_s11] sm:$0xff] %vm51_vm0, %v246_v51 }
 0x1c5   :  { %270 = vst.msk [vmem:[%s909_s10 + $0x8] sm:$0xff] %vm51_vm0, %v266_v50 }
 0x1c6   :  { %269 = vst.msk [vmem:[%s909_s10] sm:$0xff] %vm51_vm0, %v265_v52  ;;  %v600_v53 = vpop.f32.mrb[2].mxu1  ;;  %609 = vmatprep.mubr.msk.f32.mxu0 %vm51_vm0, %v265_v52 }
 0x1c7   :  { %v268_v54 = vsub.f32 %v163_v30, %v600_v53  ;;  %276 = vst.msk [vmem:[%s908_s11 + $0x18] sm:$0xff] %vm51_vm0, %v600_v53  ;;  %v256_v55 = vpop.f32.mrb[3].mxu1  ;;  %610 = vmatmul.mubr.msk.f32.vlgmr.msra.gmra.mrb[4].mxu0 %vm51_vm0, %v266_v50 }
 0x1c8   :  { %v267_v56 = vsub.f32 %v162_v33, %v256_v55  ;;  %275 = vst.msk [vmem:[%s908_s11 + $0x10] sm:$0xff] %vm51_vm0, %v256_v55 }
 0x1c9   :  { %272 = vst.msk [vmem:[%s909_s10 + $0x18] sm:$0xff] %vm51_vm0, %v268_v54 }
 0x1ca   :  { %271 = vst.msk [vmem:[%s909_s10 + $0x10] sm:$0xff] %vm51_vm0, %v267_v56  ;;  %612 = vmatprep.mubr.msk.f32.mxu0 %vm51_vm0, %v267_v56  ;;  %v625_v58 = vpop.f32.mrb[4].mxu1 }
 0x1cb   :  { %613 = vmatmul.mubr.msk.f32.gmra.mrb[6].mxu0 %vm51_vm0, %v268_v54  ;;  %v488_v59 = vadd.f32 %v625_v58, %v536_v57  ;;  %v482_v60 = vpop.f32.mrb[5].mxu1 }
 0x1cc   :  { %v483_v61 = vadd.f32 %v536_v57, %v482_v60 }
 0x1cd   :  { %503 = vst.msk [vmem:[%s911_s13 + $0x8] sm:$0xff] %vm501_vm1, %v488_v59 }
 0x1ce   :  { %502 = vst.msk [vmem:[%s911_s13] sm:$0xff] %vm501_vm1, %v483_v61  ;;  %v628_v62 = vpop.f32.mrb[6].mxu1 }
 0x1cf   :  { %v498_v63 = vadd.f32 %v628_v62, %v536_v57  ;;  %v492_v0 = vpop.f32.mrb[7].mxu1 }
 0x1d0   :  { %v493_v1 = vadd.f32 %v536_v57, %v492_v0 }
 0x1d1   :  { %505 = vst.msk [vmem:[%s911_s13 + $0x18] sm:$0xff] %vm501_vm1, %v498_v63 }
 0x1d2   :  { %504 = vst.msk [vmem:[%s911_s13 + $0x10] sm:$0xff] %vm501_vm1, %v493_v1 }
 0x29a   :  { %v611_v3 = vpop.f32.mrb[4].mxu0 }
 0x29b   :  { %v372_v4 = vadd.f32 %v611_v3, %v531_v2  ;;  %v366_v5 = vpop.f32.mrb[5].mxu0 }
 0x29c   :  { %v367_v6 = vadd.f32 %v531_v2, %v366_v5 }
 0x29d   :  { %386 = vst.msk [vmem:[%s913_s12 + $0x8] sm:$0xff] %vm51_vm0, %v372_v4 }
 0x29e   :  { %385 = vst.msk [vmem:[%s913_s12] sm:$0xff] %vm51_vm0, %v367_v6  ;;  %v614_v7 = vpop.f32.mrb[6].mxu0 }
 0x29f   :  { %v382_v8 = vadd.f32 %v614_v7, %v531_v2  ;;  %v376_v9 = vpop.f32.mrb[7].mxu0 }
 0x2a0   :  { %v377_v10 = vadd.f32 %v531_v2, %v376_v9 }
 0x2a1   :  { %388 = vst.msk [vmem:[%s913_s12 + $0x18] sm:$0xff] %vm51_vm0, %v382_v8 }
 0x2a2   :  { %387 = vst.msk [vmem:[%s913_s12 + $0x10] sm:$0xff] %vm51_vm0, %v377_v10 }

// kernel: _lambda_.29
= control target key start
LH: loop header
LB: loop body
LE: loop exit
PB: predicated region body
PF: predicated region fallthrough
CT: control target
= control target key end

     0   :  { %vm32_vm0 = vcmask 261120   ;;  %vm333_vm1 = vcmask 7168   ;;  %s546_s1 = inlined_call_operand.vmem [shape: f32[32,32], index: 1, kind: input, shape index: {}]   ;;  %s547_s0 = inlined_call_operand.vmem [shape: f32[32,32], index: 0, kind: input, shape index: {}]   ;;  %s548_s4 = inlined_call_operand.vmem [shape: f32[32,1], index: 4, kind: input, shape index: {}]   ;;  %s549_s2 = inlined_call_operand.vmem [shape: f32[1,32], index: 2, kind: input, shape index: {}]   ;;  %s550_s3 = inlined_call_operand.vmem [shape: f32[1,32], index: 3, kind: input, shape index: {}]   ;;  %s551_s5 = inlined_call_operand.<no memory space> [shape: f32[1,1], index: 5, kind: input, shape index: {}]   ;;  %s552_s6 = inlined_call_operand.vmem [shape: f32[32,1], index: 6, kind: input, shape index: {}]   ;;  %s553_s7 = inlined_call_operand.vmem [shape: f32[32,1], index: 7, kind: output, shape index: {}]  }
   0x1   :  { %v28_v0 = vld [vmem:[%s546_s1] sm:$0xff]  ;;  %v30_v1 = vld [vmem:[%s546_s1 + $0x10] sm:$0xff]  ;;  %v29_v2 = vld [vmem:[%s546_s1 + $0x8] sm:$0xff] }
   0x2   :  { %v33_v3 = vsel %vm32_vm0, %v28_v0, 0.0  ;;  %v39_v4 = vsel %vm32_vm0, %v30_v1, 0.0  ;;  %v31_v5 = vld [vmem:[%s546_s1 + $0x18] sm:$0xff]  ;;  %v36_v6 = vsel %vm32_vm0, %v29_v2, 0.0  ;;  %v108_v28 = vld [vmem:[%s547_s0] sm:$0xff]  ;;  %v218_v30 = vld [vmem:[%s548_s4 + $0x8] sm:$0xff] }
   0x3   :  { %34 = vadd.xlane.f32.xlu0 %v33_v3  ;;  %40 = vadd.xlane.f32.xlu1 %v39_v4  ;;  %v42_v7 = vsel %vm32_vm0, %v31_v5, 0.0  ;;  %v217_v29 = vld [vmem:[%s548_s4] sm:$0xff]  ;;  %v219_v3 = vld [vmem:[%s548_s4 + $0x10] sm:$0xff]  ;;  %v220_v4 = vld [vmem:[%s548_s4 + $0x18] sm:$0xff] }
   0x4   :  { %377 = vmatprep.mubr.msk.f32.mxu0 %vm32_vm0, %v108_v28  ;;  %v405_v31 = vpack.c.bf16 %v218_v30, %v217_v29  ;;  %v342_v46 = vld [vmem:[%s549_s2] ss:$0 sm:$0xff] }
   0x5   :  { %v343_v51 = vld [vmem:[%s550_s3] ss:$0 sm:$0xff] }
   0x6   :  { %406 = vmatprep.subr.bf16.mxu1 %v405_v31 }
   0x7   :  { %37 = vadd.xlane.f32.xlu0 %v36_v6  ;;  %43 = vadd.xlane.f32.xlu1 %v42_v7  ;;  %v12_v6 = vstv %s551_s5 }
   0x8   :  { %408 = vmatpush3.bf16.msra.mxu1 %v405_v31  ;;  %13 = vst [vmem:[#allocation2] sm:$0x1] %v12_v6 }
  0x90   :  { %v35_v8 = vpop.xlane.xlu0 %34  ;;  %v41_v9 = vpop.xlane.xlu1 %40 }
  0x91   :  { %v46_v10 = vmul.f32 0.03125, %v35_v8  ;;  %v48_v11 = vmul.f32 0.03125, %v41_v9 }
  0x93   :  { %v50_v12 = vsub.f32 %v28_v0, %v46_v10  ;;  %v52_v13 = vsub.f32 %v30_v1, %v48_v11  ;;  %v109_v0 = vld [vmem:[%s547_s0 + $0x8] sm:$0xff]  ;;  %v110_v1 = vld [vmem:[%s547_s0 + $0x10] sm:$0xff] }
  0x94   :  { %v38_v14 = vpop.xlane.xlu0 %37  ;;  %v44_v15 = vpop.xlane.xlu1 %43 }
  0x95   :  { %v47_v16 = vmul.f32 0.03125, %v38_v14  ;;  %v49_v17 = vmul.f32 0.03125, %v44_v15  ;;  %v54_v18 = vmul.f32 %v50_v12, %v50_v12  ;;  %v56_v19 = vmul.f32 %v52_v13, %v52_v13  ;;  %v214_v15 = vld [vmem:[%s552_s6 + $0x8] sm:$0xff] }
  0x97   :  { %v51_v20 = vsub.f32 %v29_v2, %v47_v16  ;;  %v53_v21 = vsub.f32 %v31_v5, %v49_v17  ;;  %v58_v22 = vsel %vm32_vm0, %v54_v18, 0.0  ;;  %v64_v23 = vsel %vm32_vm0, %v56_v19, 0.0  ;;  %v111_v2 = vld [vmem:[%s547_s0 + $0x18] sm:$0xff]  ;;  %v213_v16 = vld [vmem:[%s552_s6] sm:$0xff] }
  0x98   :  { %59 = vadd.xlane.f32.xlu0 %v58_v22  ;;  %v409_v5 = vpack.c.bf16 %v220_v4, %v219_v3  ;;  %v352_v18 = vld [vmem:[#allocation2] ss:$0 sm:$0xff]  ;;  %v216_v22 = vld [vmem:[%s552_s6 + $0x18] sm:$0xff] }
  0x99   :  { %v55_v24 = vmul.f32 %v51_v20, %v51_v20  ;;  %v57_v25 = vmul.f32 %v53_v21, %v53_v21 }
  0x9a   :  { %410 = vmatprep.subr.bf16.mxu1 %v409_v5 }
  0x9b   :  { %v61_v26 = vsel %vm32_vm0, %v55_v24, 0.0  ;;  %v67_v27 = vsel %vm32_vm0, %v57_v25, 0.0  ;;  %412 = vmatpush3.bf16.msra.mxu1 %v409_v5  ;;  %v215_v24 = vld [vmem:[%s552_s6 + $0x10] sm:$0xff] }
  0x9c   :  { %65 = vadd.xlane.f32.xlu0 %v64_v23  ;;  %62 = vadd.xlane.f32.xlu1 %v61_v26 }
  0xa0   :  { %68 = vadd.xlane.f32.xlu1 %v67_v27 }
 0x125   :  { %v60_v32 = vpop.xlane.xlu0 %59 }
 0x126   :  { %v70_v33 = vmul.f32 0.03125, %v60_v32 }
 0x128   :  { %v74_v34 = vadd.f32 1e-05, %v70_v33 }
 0x129   :  { %v63_v35 = vpop.xlane.xlu1 %62  ;;  %v66_v36 = vpop.xlane.xlu0 %65 }
 0x12a   :  { %413 = vrsqrt.f32 %v74_v34  ;;  %v71_v37 = vmul.f32 0.03125, %v63_v35  ;;  %v72_v38 = vmul.f32 0.03125, %v66_v36 }
 0x12c   :  { %v75_v39 = vadd.f32 1e-05, %v71_v37  ;;  %v76_v40 = vadd.f32 1e-05, %v72_v38 }
 0x12d   :  { %v69_v41 = vpop.xlane.xlu1 %68 }
 0x12e   :  { %415 = vrsqrt.f32 %v75_v39  ;;  %v73_v42 = vmul.f32 0.03125, %v69_v41 }
 0x12f   :  { %417 = vrsqrt.f32 %v76_v40 }
 0x130   :  { %v77_v43 = vadd.f32 1e-05, %v73_v42 }
 0x132   :  { %419 = vrsqrt.f32 %v77_v43 }
 0x134   :  { %v414_v44 = vpop.eup %413 }
 0x135   :  { %v82_v45 = vmul.f32 %v414_v44, %v50_v12 }
 0x137   :  { %v93_v50 = vmul.f32 %v342_v46, %v82_v45 }
 0x138   :  { %v416_v47 = vpop.eup %415 }
 0x139   :  { %v418_v48 = vpop.eup %417  ;;  %v83_v49 = vmul.f32 %v416_v47, %v51_v20  ;;  %v104_v55 = vadd.f32 %v343_v51, %v93_v50 }
 0x13a   :  { %v84_v52 = vmul.f32 %v418_v48, %v52_v13 }
 0x13b   :  { %v94_v53 = vmul.f32 %v342_v46, %v83_v49 }
 0x13c   :  { %v420_v54 = vpop.eup %419  ;;  %v95_v58 = vmul.f32 %v342_v46, %v84_v52 }
 0x13d   :  { %v105_v56 = vadd.f32 %v343_v51, %v94_v53  ;;  %v85_v57 = vmul.f32 %v420_v54, %v53_v21 }
 0x13e   :  { %v106_v61 = vadd.f32 %v343_v51, %v95_v58 }
 0x13f   :  { %v397_v59 = vpack.c.bf16 %v105_v56, %v104_v55  ;;  %v96_v60 = vmul.f32 %v342_v46, %v85_v57 }
 0x141   :  { %398 = vmatprep.subr.bf16.mxu0 %v397_v59  ;;  %v107_v62 = vadd.f32 %v343_v51, %v96_v60 }
 0x142   :  { %400 = vmatpush3.bf16.msra.mxu0 %v397_v59 }
 0x143   :  { %v401_v63 = vpack.c.bf16 %v107_v62, %v106_v61 }
 0x145   :  { %402 = vmatprep.subr.bf16.mxu0 %v401_v63 }
 0x146   :  { %404 = vmatpush3.bf16.msra.mxu0 %v401_v63 }
 0x149   :  { %378 = vmatmul.mubr.msk.f32.vlgmr.msra.gmra.mrb[0].mxu0 %vm32_vm0, %v109_v0 }
 0x14a   :  { %380 = vmatprep.mubr.msk.f32.mxu0 %vm32_vm0, %v110_v1 }
 0x14d   :  { %381 = vmatmul.mubr.msk.f32.gmra.mrb[2].mxu0 %vm32_vm0, %v111_v2 }
 0x21c   :  { %v379_v7 = vpop.f32.mrb[0].mxu0 }
 0x21d   :  { %v190_v8 = vpop.f32.mrb[1].mxu0  ;;  %v210_v10 = vsub.f32 %v105_v56, %v379_v7 }
 0x21e   :  { %v209_v9 = vsub.f32 %v104_v55, %v190_v8 }
 0x220   :  { %v382_v11 = vpop.f32.mrb[2].mxu0  ;;  %391 = vmatprep.mubr.msk.f32.mxu1 %vm32_vm0, %v209_v9 }
 0x221   :  { %v200_v12 = vpop.f32.mrb[3].mxu0  ;;  %392 = vmatmul.mubr.msk.f32.vlgmr.msra.gmra.mrb[0].mxu1 %vm32_vm0, %v210_v10  ;;  %v212_v14 = vsub.f32 %v107_v62, %v382_v11 }
 0x222   :  { %v211_v13 = vsub.f32 %v106_v61, %v200_v12 }
 0x224   :  { %394 = vmatprep.mubr.msk.f32.mxu1 %vm32_vm0, %v211_v13 }
 0x225   :  { %395 = vmatmul.mubr.msk.f32.gmra.mrb[2].mxu1 %vm32_vm0, %v212_v14 }
 0x2f4   :  { %v393_v17 = vpop.f32.mrb[0].mxu1 }
 0x2f5   :  { %v319_v19 = vadd.f32 %v393_v17, %v214_v15  ;;  %v299_v20 = vpop.f32.mrb[1].mxu1 }
 0x2f6   :  { %v318_v21 = vadd.f32 %v299_v20, %v213_v16 }
 0x2f7   :  { %v330_v23 = vadd.f32 %v352_v18, %v319_v19 }
 0x2f8   :  { %v329_v25 = vadd.f32 %v352_v18, %v318_v21  ;;  %v396_v26 = vpop.f32.mrb[2].mxu1 }
 0x2f9   :  { %335 = vst.msk [vmem:[%s553_s7 + $0x8] sm:$0xff] %vm333_vm1, %v330_v23  ;;  %v321_v27 = vadd.f32 %v396_v26, %v216_v22  ;;  %v309_v28 = vpop.f32.mrb[3].mxu1 }
 0x2fa   :  { %334 = vst.msk [vmem:[%s553_s7] sm:$0xff] %vm333_vm1, %v329_v25  ;;  %v320_v29 = vadd.f32 %v309_v28, %v215_v24 }
 0x2fb   :  { %v332_v30 = vadd.f32 %v352_v18, %v321_v27 }
 0x2fc   :  { %v331_v31 = vadd.f32 %v352_v18, %v320_v29 }
 0x2fd   :  { %337 = vst.msk [vmem:[%s553_s7 + $0x18] sm:$0xff] %vm333_vm1, %v332_v30 }
 0x2fe   :  { %336 = vst.msk [vmem:[%s553_s7 + $0x10] sm:$0xff] %vm333_vm1, %v331_v31 }

// kernel: _lambda_.25
= control target key start
LH: loop header
LB: loop body
LE: loop exit
PB: predicated region body
PF: predicated region fallthrough
CT: control target
= control target key end

     0   :  { %vm59_vm0 = vcmask 261120   ;;  %vm1121_vm1 = vcmask 7168   ;;  %s1928_s7 = inlined_call_operand.vmem [shape: f32[32,32], index: 7, kind: input, shape index: {}]   ;;  %s1929_s3 = inlined_call_operand.vmem [shape: f32[32,32], index: 3, kind: input, shape index: {}]   ;;  %s1930_s0 = inlined_call_operand.vmem [shape: f32[32,32], index: 0, kind: input, shape index: {}]   ;;  %s1931_s9 = inlined_call_operand.vmem [shape: f32[32,128], index: 9, kind: input, shape index: {}]   ;;  %s1932_s4 = inlined_call_operand.vmem [shape: f32[32,32], index: 4, kind: input, shape index: {}]   ;;  %s1933_s8 = inlined_call_operand.vmem [shape: f32[1,32], index: 8, kind: input, shape index: {}]   ;;  %s1934_s10 = inlined_call_operand.vmem [shape: f32[128,32], index: 10, kind: input, shape index: {}]   ;;  %s1935_s1 = inlined_call_operand.vmem [shape: f32[32,32], index: 1, kind: input, shape index: {}]   ;;  %s1936_s2 = inlined_call_operand.vmem [shape: f32[32,32], index: 2, kind: input, shape index: {}]   ;;  %s1937_s5 = inlined_call_operand.vmem [shape: f32[32,32], index: 5, kind: input, shape index: {}]   ;;  %s1938_s12 = inlined_call_operand.vmem [shape: f32[32,32], index: 12, kind: output, shape index: {0}]   ;;  %s1939_s11 = inlined_call_operand.vmem [shape: f32[96,1], index: 11, kind: input, shape index: {}]   ;;  %s1940_s6 = inlined_call_operand.vmem [shape: f32[32,1], index: 6, kind: input, shape index: {}]   ;;  %s1941_s13 = inlined_call_operand.vmem [shape: f32[32,1], index: 13, kind: output, shape index: {1}]  }
   0x1   :  { %v55_v0 = vld [vmem:[%s1928_s7] sm:$0xff]  ;;  %v56_v1 = vld [vmem:[%s1928_s7 + $0x8] sm:$0xff]  ;;  %v57_v2 = vld [vmem:[%s1928_s7 + $0x10] sm:$0xff] }
   0x2   :  { %v1427_v3 = vpack.c.bf16 %v56_v1, %v55_v0  ;;  %v58_v4 = vld [vmem:[%s1928_s7 + $0x18] sm:$0xff]  ;;  %v51_v5 = vld [vmem:[%s1929_s3] sm:$0xff]  ;;  %v52_v7 = vld [vmem:[%s1929_s3 + $0x8] sm:$0xff] }
   0x3   :  { %v1431_v6 = vpack.c.bf16 %v58_v4, %v57_v2  ;;  %1271 = vmatprep.mubr.msk.f32.mxu0 %vm59_vm0, %v51_v5  ;;  %v53_v8 = vld [vmem:[%s1929_s3 + $0x10] sm:$0xff]  ;;  %v54_v9 = vld [vmem:[%s1929_s3 + $0x18] sm:$0xff]  ;;  %v1652_v10 = vld [vmem:[%s1930_s0] sm:$0xff] }
   0x4   :  { %1428 = vmatprep.subr.bf16.mxu0 %v1427_v3  ;;  %1285 = vmatprep.mubr.msk.f32.mxu1 %vm59_vm0, %v1652_v10  ;;  %v273_v11 = vld [vmem:[%s1931_s9] sm:$0xff]  ;;  %v274_v12 = vld [vmem:[%s1931_s9 + $0x8] sm:$0xff]  ;;  %v50_v21 = vld [vmem:[%s1932_s4 + $0x18] sm:$0xff] }
   0x5   :  { %1430 = vmatpush3.bf16.msra.mxu0 %v1427_v3  ;;  %v1443_v13 = vpack.c.bf16 %v274_v12, %v273_v11  ;;  %v48_v14 = vld [vmem:[%s1932_s4 + $0x8] sm:$0xff]  ;;  %v47_v15 = vld [vmem:[%s1932_s4] sm:$0xff]  ;;  %v49_v23 = vld [vmem:[%s1932_s4 + $0x10] sm:$0xff] }
   0x6   :  { %1432 = vmatprep.subr.bf16.mxu0 %v1431_v6  ;;  %v1138_v17 = vld [vmem:[%s1933_s8] ss:$0 sm:$0xff]  ;;  %v1680_v33 = vld [vmem:[%s1930_s0 + $0x8] sm:$0xff]  ;;  %v1685_v34 = vld [vmem:[%s1930_s0 + $0x10] sm:$0xff] }
   0x7   :  { %v1694_v35 = vld [vmem:[%s1930_s0 + $0x18] sm:$0xff]  ;;  %v275_v36 = vld [vmem:[%s1931_s9 + $0x10] sm:$0xff]  ;;  %v394_v39 = vld [vmem:[%s1934_s10] sm:$0xff] }
   0x8   :  { %v276_v37 = vld [vmem:[%s1931_s9 + $0x18] sm:$0xff]  ;;  %v395_v40 = vld [vmem:[%s1934_s10 + $0x8] sm:$0xff]  ;;  %v396_v41 = vld [vmem:[%s1934_s10 + $0x10] sm:$0xff] }
   0x9   :  { %1434 = vmatpush3.bf16.msra.mxu0 %v1431_v6  ;;  %v1447_v38 = vpack.c.bf16 %v276_v37, %v275_v36  ;;  %v1451_v42 = vpack.c.bf16 %v395_v40, %v394_v39  ;;  %v397_v43 = vld [vmem:[%s1934_s10 + $0x18] sm:$0xff]  ;;  %v398_v45 = vld [vmem:[%s1934_s10 + $0x20] sm:$0xff]  ;;  %v399_v46 = vld [vmem:[%s1934_s10 + $0x28] sm:$0xff] }
   0xa   :  { %1444 = vmatprep.subr.bf16.mxu0 %v1443_v13  ;;  %v1455_v44 = vpack.c.bf16 %v397_v43, %v396_v41  ;;  %v1459_v47 = vpack.c.bf16 %v399_v46, %v398_v45  ;;  %v400_v56 = vld [vmem:[%s1934_s10 + $0x30] sm:$0xff]  ;;  %v401_v57 = vld [vmem:[%s1934_s10 + $0x38] sm:$0xff]  ;;  %v402_v59 = vld [vmem:[%s1934_s10 + $0x40] sm:$0xff] }
   0xb   :  { %v1463_v58 = vpack.c.bf16 %v401_v57, %v400_v56  ;;  %v403_v60 = vld [vmem:[%s1934_s10 + $0x48] sm:$0xff]  ;;  %v404_v62 = vld [vmem:[%s1934_s10 + $0x50] sm:$0xff]  ;;  %v405_v63 = vld [vmem:[%s1934_s10 + $0x58] sm:$0xff] }
   0xc   :  { %1272 = vmatmul.mubr.msk.f32.vlgmr.msra.gmra.mrb[0].mxu0 %vm59_vm0, %v52_v7  ;;  %v1467_v61 = vpack.c.bf16 %v403_v60, %v402_v59  ;;  %v1471_v0 = vpack.c.bf16 %v405_v63, %v404_v62  ;;  %v406_v1 = vld [vmem:[%s1934_s10 + $0x60] sm:$0xff]  ;;  %v407_v2 = vld [vmem:[%s1934_s10 + $0x68] sm:$0xff]  ;;  %v408_v4 = vld [vmem:[%s1934_s10 + $0x70] sm:$0xff] }
   0xd   :  { %1274 = vmatprep.mubr.msk.f32.mxu0 %vm59_vm0, %v53_v8  ;;  %1446 = vmatpush3.bf16.msra.mxu0 %v1443_v13  ;;  %v1475_v3 = vpack.c.bf16 %v407_v2, %v406_v1  ;;  %v409_v5 = vld [vmem:[%s1934_s10 + $0x78] sm:$0xff]  ;;  %v911_v45 = vld [vmem:[%s1936_s2] sm:$0xff]  ;;  %v613_v1 = vld [vmem:[%s1939_s11 + $0x48] sm:$0xff] }
   0xe   :  { %1448 = vmatprep.subr.bf16.mxu0 %v1447_v38  ;;  %v1479_v6 = vpack.c.bf16 %v409_v5, %v408_v4 }
  0x10   :  { %1275 = vmatmul.mubr.msk.f32.gmra.mrb[2].mxu0 %vm59_vm0, %v54_v9 }
  0x11   :  { %1450 = vmatpush3.bf16.msra.mxu0 %v1447_v38 }
  0xdf   :  { %v1273_v16 = vpop.f32.mrb[0].mxu0 }
  0xe0   :  { %v158_v18 = vadd.f32 %v1273_v16, %v48_v14  ;;  %v138_v19 = vpop.f32.mrb[1].mxu0 }
  0xe1   :  { %v157_v20 = vadd.f32 %v138_v19, %v47_v15 }
  0xe2   :  { %v169_v22 = vadd.f32 %v1138_v17, %v158_v18 }
  0xe3   :  { %v168_v24 = vadd.f32 %v1138_v17, %v157_v20  ;;  %v1276_v25 = vpop.f32.mrb[2].mxu0 }
  0xe4   :  { %v160_v26 = vadd.f32 %v1276_v25, %v50_v21  ;;  %v148_v27 = vpop.f32.mrb[3].mxu0 }
  0xe5   :  { %v159_v28 = vadd.f32 %v148_v27, %v49_v23  ;;  %v1435_v29 = vpack.c.bf16 %v169_v22, %v168_v24 }
  0xe6   :  { %v171_v30 = vadd.f32 %v1138_v17, %v160_v26 }
  0xe7   :  { %v170_v31 = vadd.f32 %v1138_v17, %v159_v28  ;;  %1436 = vmatprep.subr.bf16.mxu1 %v1435_v29 }
  0xe8   :  { %1438 = vmatpush3.bf16.msra.mxu1 %v1435_v29 }
  0xe9   :  { %v1439_v32 = vpack.c.bf16 %v171_v30, %v170_v31 }
  0xeb   :  { %1440 = vmatprep.subr.bf16.mxu1 %v1439_v32 }
  0xec   :  { %1442 = vmatpush3.bf16.msra.mxu1 %v1439_v32 }
  0xed   :  { %1452 = vmatprep.subr.bf16.mxu1 %v1451_v42 }
  0xef   :  { %1286 = vmatmul.mubr.msk.f32.vlgmr.msra.gmra.mrb[0].mxu1 %vm59_vm0, %v1680_v33 }
  0xf0   :  { %1288 = vmatprep.mubr.msk.f32.mxu1 %vm59_vm0, %v1685_v34  ;;  %1454 = vmatpush3.bf16.msra.mxu1 %v1451_v42 }
  0xf1   :  { %1456 = vmatprep.subr.bf16.mxu1 %v1455_v44 }
  0xf3   :  { %1289 = vmatmul.mubr.msk.f32.gmra.mrb[2].mxu1 %vm59_vm0, %v1694_v35 }
  0xf4   :  { %1458 = vmatpush3.bf16.msra.mxu1 %v1455_v44  ;;  %v616_v44 = vld [vmem:[%s1935_s1] sm:$0xff] }
  0xf5   :  { %1460 = vmatprep.subr.bf16.mxu1 %v1459_v47 }
  0xf8   :  { %1462 = vmatpush3.bf16.msra.mxu1 %v1459_v47  ;;  %v595_v47 = vld [vmem:[%s1937_s5 + $0x18] sm:$0xff] }
  0xf9   :  { %1464 = vmatprep.subr.bf16.mxu1 %v1463_v58 }
  0xfc   :  { %1466 = vmatpush3.bf16.msra.mxu1 %v1463_v58 }
  0xfd   :  { %1468 = vmatprep.subr.bf16.mxu1 %v1467_v61 }
 0x100   :  { %1470 = vmatpush3.bf16.msra.mxu1 %v1467_v61  ;;  %v608_v61 = vld [vmem:[%s1939_s11 + $0x20] sm:$0xff] }
 0x101   :  { %1472 = vmatprep.subr.bf16.mxu1 %v1471_v0 }
 0x104   :  { %1474 = vmatpush3.bf16.msra.mxu1 %v1471_v0  ;;  %v609_v0 = vld [vmem:[%s1939_s11 + $0x28] sm:$0xff] }
 0x105   :  { %1476 = vmatprep.subr.bf16.mxu1 %v1475_v3  ;;  %v1499_v5 = vpack.c.bf16 %v609_v0, %v608_v61 }
 0x108   :  { %1478 = vmatpush3.bf16.msra.mxu1 %v1475_v3 }
 0x109   :  { %1480 = vmatprep.subr.bf16.mxu1 %v1479_v6 }
 0x10c   :  { %1482 = vmatpush3.bf16.msra.mxu1 %v1479_v6 }
 0x1c2   :  { %v1722_v48 = vpop.f32.mrb[0].mxu1 }
 0x1c3   :  { %v1724_v49 = vpop.f32.mrb[1].mxu1  ;;  %v1730_v51 = vsub.f32 %v169_v22, %v1722_v48 }
 0x1c4   :  { %v1727_v50 = vsub.f32 %v168_v24, %v1724_v49 }
 0x1c6   :  { %v1732_v52 = vpop.f32.mrb[2].mxu1  ;;  %1299 = vmatprep.mubr.msk.f32.mxu0 %vm59_vm0, %v1727_v50 }
 0x1c7   :  { %v1736_v53 = vpop.f32.mrb[3].mxu1  ;;  %1300 = vmatmul.mubr.msk.f32.vlgmr.msra.gmra.mrb[4].mxu0 %vm59_vm0, %v1730_v51  ;;  %v1744_v55 = vsub.f32 %v171_v30, %v1732_v52  ;;  %v599_v59 = vadd.f32 %v1732_v52, %v595_v47 }
 0x1c8   :  { %v1741_v54 = vsub.f32 %v170_v31, %v1736_v53 }
 0x1ca   :  { %1302 = vmatprep.mubr.msk.f32.mxu0 %vm59_vm0, %v1741_v54 }
 0x1cb   :  { %1303 = vmatmul.mubr.msk.f32.gmra.mrb[6].mxu0 %vm59_vm0, %v1744_v55 }
 0x1cc   :  { %1351 = vmatprep.mubr.msk.f32.mxu0 %vm59_vm0, %v1652_v10 }
 0x29a   :  { %v1301_v7 = vpop.f32.mrb[4].mxu0 }
 0x29b   :  { %v379_v8 = vmul.f32 0.70710677, %v1301_v7  ;;  %v355_v9 = vpop.f32.mrb[5].mxu0  ;;  %v375_v20 = vmul.f32 0.5, %v1301_v7  ;;  %v610_v7 = vld [vmem:[%s1939_s11 + $0x30] sm:$0xff] }
 0x29c   :  { %v378_v10 = vmul.f32 0.70710677, %v355_v9  ;;  %v374_v18 = vmul.f32 0.5, %v355_v9  ;;  %v617_v9 = vld [vmem:[%s1935_s1 + $0x8] sm:$0xff] }
 0x29d   :  { %1543 = verf.f32 %v379_v8  ;;  %v611_v8 = vld [vmem:[%s1939_s11 + $0x38] sm:$0xff] }
 0x29e   :  { %1545 = verf.f32 %v378_v10  ;;  %v1304_v11 = vpop.f32.mrb[6].mxu0  ;;  %v912_v10 = vld [vmem:[%s1936_s2 + $0x8] sm:$0xff] }
 0x29f   :  { %v381_v12 = vmul.f32 0.70710677, %v1304_v11  ;;  %v365_v13 = vpop.f32.mrb[7].mxu0  ;;  %v377_v28 = vmul.f32 0.5, %v1304_v11  ;;  %v618_v11 = vld [vmem:[%s1935_s1 + $0x10] sm:$0xff] }
 0x2a0   :  { %v380_v14 = vmul.f32 0.70710677, %v365_v13  ;;  %v376_v26 = vmul.f32 0.5, %v365_v13  ;;  %v913_v13 = vld [vmem:[%s1936_s2 + $0x10] sm:$0xff] }
 0x2a1   :  { %1547 = verf.f32 %v381_v12  ;;  %v1503_v12 = vpack.c.bf16 %v611_v8, %v610_v7 }
 0x2a2   :  { %1549 = verf.f32 %v380_v14  ;;  %v604_v14 = vld [vmem:[%s1939_s11] sm:$0xff] }
 0x2a7   :  { %v1544_v15 = vpop.eup %1543 }
 0x2a8   :  { %v1546_v16 = vpop.eup %1545  ;;  %v387_v17 = vadd.f32 1.0, %v1544_v15  ;;  %v605_v15 = vld [vmem:[%s1939_s11 + $0x8] sm:$0xff] }
 0x2a9   :  { %v386_v19 = vadd.f32 1.0, %v1546_v16  ;;  %v619_v16 = vld [vmem:[%s1935_s1 + $0x18] sm:$0xff] }
 0x2aa   :  { %v391_v24 = vmul.f32 %v387_v17, %v375_v20  ;;  %v914_v17 = vld [vmem:[%s1936_s2 + $0x18] sm:$0xff] }
 0x2ab   :  { %v1548_v21 = vpop.eup %1547  ;;  %v390_v22 = vmul.f32 %v386_v19, %v374_v18  ;;  %v1507_v18 = vpack.c.bf16 %v605_v15, %v604_v14  ;;  %v606_v19 = vld [vmem:[%s1939_s11 + $0x10] sm:$0xff]  ;;  %v607_v20 = vld [vmem:[%s1939_s11 + $0x18] sm:$0xff] }
 0x2ac   :  { %v1550_v23 = vpop.eup %1549  ;;  %v389_v25 = vadd.f32 1.0, %v1548_v21  ;;  %v1511_v21 = vpack.c.bf16 %v607_v20, %v606_v19 }
 0x2ad   :  { %v388_v27 = vadd.f32 1.0, %v1550_v23  ;;  %1337 = vmatprep.mubr.f32.mxu1 %v390_v22  ;;  %v614_v22 = vld [vmem:[%s1939_s11 + $0x50] sm:$0xff]  ;;  %v615_v23 = vld [vmem:[%s1939_s11 + $0x58] sm:$0xff] }
 0x2ae   :  { %1338 = vmatmul.mubr.f32.vlgmr.msra.gmra.mrb[4].mxu1 %v391_v24  ;;  %v393_v30 = vmul.f32 %v389_v25, %v377_v28  ;;  %v1527_v24 = vpack.c.bf16 %v615_v23, %v614_v22 }
 0x2af   :  { %v392_v29 = vmul.f32 %v388_v27, %v376_v26 }
 0x2b1   :  { %1340 = vmatprep.mubr.f32.mxu1 %v392_v29 }
 0x2b2   :  { %1341 = vmatmul.mubr.f32.gmra.mrb[6].mxu1 %v393_v30 }
 0x2b3   :  { %1407 = vmatprep.mubr.msk.f32.mxu1 %vm59_vm0, %v911_v45 }
 0x381   :  { %v1339_v31 = vpop.f32.mrb[4].mxu1 }
 0x382   :  { %v496_v32 = vadd.f32 %v1339_v31, %v1730_v51  ;;  %v476_v36 = vpop.f32.mrb[5].mxu1  ;;  %v594_v51 = vld [vmem:[%s1937_s5 + $0x10] sm:$0xff] }
 0x383   :  { %v495_v37 = vadd.f32 %v476_v36, %v1727_v50 }
 0x385   :  { %v1483_v38 = vpack.c.bf16 %v496_v32, %v495_v37  ;;  %v1342_v39 = vpop.f32.mrb[6].mxu1 }
 0x386   :  { %v498_v40 = vadd.f32 %v1342_v39, %v1744_v55  ;;  %v486_v41 = vpop.f32.mrb[7].mxu1 }
 0x387   :  { %v497_v42 = vadd.f32 %v486_v41, %v1741_v54  ;;  %1484 = vmatprep.subr.bf16.mxu0 %v1483_v38 }
 0x388   :  { %1486 = vmatpush3.bf16.msra.mxu0 %v1483_v38  ;;  %v1116_v38 = vld [vmem:[%s1940_s6 + $0x18] sm:$0xff] }
 0x389   :  { %v1487_v43 = vpack.c.bf16 %v498_v40, %v497_v42 }
 0x38b   :  { %1488 = vmatprep.subr.bf16.mxu0 %v1487_v43 }
 0x38c   :  { %1490 = vmatpush3.bf16.msra.mxu0 %v1487_v43 }
 0x38f   :  { %1352 = vmatmul.mubr.msk.f32.vlgmr.msra.gmra.mrb[8].mxu0 %vm59_vm0, %v1680_v33  ;;  %v593_v33 = vld [vmem:[%s1937_s5 + $0x8] sm:$0xff] }
 0x390   :  { %1354 = vmatprep.mubr.msk.f32.mxu0 %vm59_vm0, %v1685_v34  ;;  %v592_v34 = vld [vmem:[%s1937_s5] sm:$0xff] }
 0x391   :  { %v596_v46 = vadd.f32 %v592_v34, %v1724_v49 }
 0x393   :  { %1355 = vmatmul.mubr.msk.f32.gmra.mrb[10].mxu0 %vm59_vm0, %v1694_v35  ;;  %v597_v35 = vadd.f32 %v1722_v48, %v593_v33  ;;  %v598_v48 = vadd.f32 %v594_v51, %v1736_v53  ;;  %v612_v53 = vld [vmem:[%s1939_s11 + $0x40] sm:$0xff] }
 0x394   :  { %1365 = vmatprep.mubr.msk.f32.mxu0 %vm59_vm0, %v616_v44  ;;  %v1523_v6 = vpack.c.bf16 %v613_v1, %v612_v53  ;;  %v1114_v44 = vld [vmem:[%s1940_s6 + $0x8] sm:$0xff]  ;;  %v1113_v33 = vld [vmem:[%s1940_s6] sm:$0xff] }
 0x462   :  { %v1353_v50 = vpop.f32.mrb[8].mxu0 }
 0x463   :  { %v585_v54 = vsub.f32 %v496_v32, %v1353_v50  ;;  %v601_v55 = vadd.f32 %v1353_v50, %v597_v35  ;;  %v565_v56 = vpop.f32.mrb[9].mxu0 }
 0x464   :  { %v584_v57 = vsub.f32 %v495_v37, %v565_v56  ;;  %v600_v58 = vadd.f32 %v596_v46, %v565_v56 }
 0x465   :  { %589 = vst.msk [vmem:[%s1938_s12 + $0x8] sm:$0xff] %vm59_vm0, %v585_v54 }
 0x466   :  { %588 = vst.msk [vmem:[%s1938_s12] sm:$0xff] %vm59_vm0, %v584_v57  ;;  %v1491_v49 = vpack.c.bf16 %v601_v55, %v600_v58  ;;  %v1356_v60 = vpop.f32.mrb[10].mxu0 }
 0x467   :  { %v587_v62 = vsub.f32 %v498_v40, %v1356_v60  ;;  %v603_v52 = vadd.f32 %v1356_v60, %v599_v59  ;;  %v575_v63 = vpop.f32.mrb[11].mxu0 }
 0x468   :  { %v586_v2 = vsub.f32 %v497_v42, %v575_v63  ;;  %v602_v3 = vadd.f32 %v598_v48, %v575_v63  ;;  %1492 = vmatprep.subr.bf16.mxu0 %v1491_v49  ;;  %1516 = vmatprep.subr.bf16.mxu1 %v1491_v49  ;;  %v1115_v42 = vld [vmem:[%s1940_s6 + $0x10] sm:$0xff] }
 0x469   :  { %591 = vst.msk [vmem:[%s1938_s12 + $0x18] sm:$0xff] %vm59_vm0, %v587_v62  ;;  %1494 = vmatpush3.bf16.msra.mxu0 %v1491_v49  ;;  %1518 = vmatpush3.bf16.msra.mxu1 %v1491_v49 }
 0x46a   :  { %590 = vst.msk [vmem:[%s1938_s12 + $0x10] sm:$0xff] %vm59_vm0, %v586_v2  ;;  %v1495_v4 = vpack.c.bf16 %v603_v52, %v602_v3 }
 0x46c   :  { %1496 = vmatprep.subr.bf16.mxu0 %v1495_v4  ;;  %1520 = vmatprep.subr.bf16.mxu1 %v1495_v4 }
 0x46d   :  { %1498 = vmatpush3.bf16.msra.mxu0 %v1495_v4  ;;  %1522 = vmatpush3.bf16.msra.mxu1 %v1495_v4 }
 0x46e   :  { %1500 = vmatprep.subr.bf16.mxu0 %v1499_v5  ;;  %1531 = vmatprep.subr.bf16.mxu1 %v1523_v6 }
 0x470   :  { %1366 = vmatmul.mubr.msk.f32.vlgmr.msra.gmra.mrb[12].mxu0 %vm59_vm0, %v617_v9  ;;  %1408 = vmatmul.mubr.msk.f32.vlgmr.msra.gmra.mrb[8].mxu1 %vm59_vm0, %v912_v10 }
 0x471   :  { %1502 = vmatpush3.bf16.msra.mxu0 %v1499_v5  ;;  %1368 = vmatprep.mubr.msk.f32.mxu0 %vm59_vm0, %v618_v11 }
 0x472   :  { %1410 = vmatprep.mubr.msk.f32.mxu1 %vm59_vm0, %v913_v13  ;;  %1504 = vmatprep.subr.bf16.mxu0 %v1503_v12 }
 0x473   :  { %1533 = vmatpush3.bf16.msra.mxu1 %v1523_v6 }
 0x474   :  { %1369 = vmatmul.mubr.msk.f32.gmra.mrb[14].mxu0 %vm59_vm0, %v619_v16  ;;  %1411 = vmatmul.mubr.msk.f32.gmra.mrb[10].mxu1 %vm59_vm0, %v914_v17 }
 0x475   :  { %1506 = vmatpush3.bf16.msra.mxu0 %v1503_v12  ;;  %1379 = vmatprep.mubr.msk.f32.mxu0 %vm59_vm0, %v600_v58 }
 0x476   :  { %1508 = vmatprep.subr.bf16.mxu0 %v1507_v18  ;;  %1532 = vmatprep.subr.bf16.mxu1 %v1527_v24 }
 0x477   :  { %1534 = vmatpush3.bf16.msra.mxu1 %v1527_v24 }
 0x478   :  { %1380 = vmatmul.mubr.msk.f32.vlgmr.msra.gmra.mrb[16].mxu0 %vm59_vm0, %v601_v55 }
 0x479   :  { %1382 = vmatprep.mubr.msk.f32.mxu0 %vm59_vm0, %v602_v3  ;;  %1510 = vmatpush3.bf16.msra.mxu0 %v1507_v18 }
 0x47a   :  { %1512 = vmatprep.subr.bf16.mxu0 %v1511_v21 }
 0x47c   :  { %1383 = vmatmul.mubr.msk.f32.gmra.mrb[18].mxu0 %vm59_vm0, %v603_v52 }
 0x47d   :  { %1514 = vmatpush3.bf16.msra.mxu0 %v1511_v21 }
 0x47e   :  { %1524 = vmatprep.subr.bf16.mxu0 %v1523_v6 }
 0x543   :  { %v1367_v25 = vpop.f32.mrb[12].mxu0  ;;  %v1409_v26 = vpop.f32.mrb[8].mxu1 }
 0x544   :  { %v698_v27 = vpop.f32.mrb[13].mxu0  ;;  %v993_v28 = vpop.f32.mrb[9].mxu1 }
 0x545   :  { %1393 = vmatprep.mubr.msk.f32.mxu0 %vm59_vm0, %v698_v27 }
 0x546   :  { %1394 = vmatmul.mubr.msk.f32.vlgmr.msra.gmra.mrb[16].mxu0 %vm59_vm0, %v1367_v25 }
 0x547   :  { %v1370_v29 = vpop.f32.mrb[14].mxu0  ;;  %v1412_v30 = vpop.f32.mrb[10].mxu1  ;;  %1526 = vmatpush3.bf16.msra.mxu0 %v1523_v6 }
 0x548   :  { %v708_v31 = vpop.f32.mrb[15].mxu0  ;;  %v1003_v32 = vpop.f32.mrb[11].mxu1  ;;  %1528 = vmatprep.subr.bf16.mxu0 %v1527_v24 }
 0x549   :  { %1396 = vmatprep.mubr.msk.f32.mxu0 %vm59_vm0, %v708_v31  ;;  %1424 = vmatprep.mubr.msk.f32.mxu1 %vm59_vm0, %v1003_v32 }
 0x54a   :  { %1397 = vmatmul.mubr.msk.f32.gmra.mrb[18].mxu0 %vm59_vm0, %v1370_v29  ;;  %1425 = vmatmul.mubr.msk.f32.vlgmr.msra.gmra.mrb[12].mxu1 %vm59_vm0, %v1412_v30 }
 0x54b   :  { %1530 = vmatpush3.bf16.msra.mxu0 %v1527_v24  ;;  %1421 = vmatprep.mubr.msk.f32.mxu0 %vm59_vm0, %v993_v28 }
 0x54e   :  { %1422 = vmatmul.mubr.msk.f32.vlgmr.msra.gmra.mrb[16].mxu0 %vm59_vm0, %v1409_v26 }
 0x61d   :  { %v1398_v36 = vpop.f32.mrb[18].mxu0  ;;  %v1426_v37 = vpop.f32.mrb[12].mxu1 }
 0x61e   :  { %v1535_v39 = vadd.f32 %v1426_v37, %v1398_v36  ;;  %v902_v40 = vpop.f32.mrb[19].mxu0  ;;  %v1100_v41 = vpop.f32.mrb[13].mxu1 }
 0x61f   :  { %v1536_v43 = vadd.f32 %v1100_v41, %v902_v40 }
 0x620   :  { %v1120_v45 = vadd.f32 %v1535_v39, %v1116_v38 }
 0x621   :  { %v1119_v34 = vadd.f32 %v1536_v43, %v1115_v42  ;;  %v1423_v35 = vpop.f32.mrb[16].mxu0 }
 0x622   :  { %1125 = vst.msk [vmem:[%s1941_s13 + $0x18] sm:$0xff] %vm1121_vm1, %v1120_v45  ;;  %v1118_v46 = vadd.f32 %v1423_v35, %v1114_v44  ;;  %v1090_v47 = vpop.f32.mrb[17].mxu0 }
 0x623   :  { %1124 = vst.msk [vmem:[%s1941_s13 + $0x10] sm:$0xff] %vm1121_vm1, %v1119_v34  ;;  %v1117_v50 = vadd.f32 %v1113_v33, %v1090_v47 }
 0x624   :  { %1123 = vst.msk [vmem:[%s1941_s13 + $0x8] sm:$0xff] %vm1121_vm1, %v1118_v46 }
 0x625   :  { %1122 = vst.msk [vmem:[%s1941_s13] sm:$0xff] %vm1121_vm1, %v1117_v50 }

</bundles_post_ra>
